<compile_context>
chip_gen: v6e
topology: v6e:2x2x1
jax: 0.10.0
libtpu: 0.0.40
codegen_flags: <defaults>
</compile_context>

<pallas_src>
import functools

import jax
import jax.numpy as jnp
from jax.experimental import pallas as pl
from jax.experimental.pallas import tpu as pltpu


# ---------------------------------------------------------------------------
# Fused BasicBlock kernel: per grid step, process one full image.
# ---------------------------------------------------------------------------
def _basic_block_kernel(xph_ref, w1_ref, b1_ref, w2_ref, b2_ref, ws_ref, bs_ref,
                        o_ref, mid_ref, *, stride, Ho, Wo):
    s = stride
    M = Ho * Wo
    Cp = o_ref.shape[-1]

    # ---- conv1 (3x3, stride s, pad 1); BN1 scale is pre-folded into w1 ----
    acc = jnp.zeros((M, Cp), jnp.float32)
    for kh in range(3):
        for kw in range(3):
            # tap (kh, kw) of the strided conv == contiguous slice of a phase
            ph = (kh % s) * s + (kw % s)
            dh, dw = kh // s, kw // s
            tap = xph_ref[ph, dh:dh + Ho, dw:dw + Wo, :]          # (Ho, Wo, Cin) bf16
            acc += jnp.dot(tap.reshape(M, tap.shape[-1]), w1_ref[kh * 3 + kw],
                           preferred_element_type=jnp.float32)
    out1 = jnp.maximum(acc + b1_ref[...], 0.0)                    # bn1 shift + ReLU

    # Stage conv1 output (with a 1-pixel zero border) in VMEM -- no HBM trip.
    mid_ref[...] = jnp.zeros_like(mid_ref)
    mid_ref[1:1 + Ho, 1:1 + Wo, :] = out1.reshape(Ho, Wo, Cp).astype(mid_ref.dtype)

    # ---- conv2 (3x3, stride 1, pad 1); BN2 scale pre-folded into w2 ----
    acc2 = jnp.zeros((M, Cp), jnp.float32)
    for kh in range(3):
        for kw in range(3):
            tap = mid_ref[kh:kh + Ho, kw:kw + Wo, :]              # (Ho, Wo, Cp) bf16
            acc2 += jnp.dot(tap.reshape(M, Cp), w2_ref[kh * 3 + kw],
                            preferred_element_type=jnp.float32)

    # ---- shortcut (1x1 strided conv + BN, or identity) fused as a matmul ----
    ph = (1 % s) * s + (1 % s)
    d = 1 // s
    xs = xph_ref[ph, d:d + Ho, d:d + Wo, :]                       # (Ho, Wo, Cin) bf16
    sc = jnp.dot(xs.reshape(M, xs.shape[-1]), ws_ref[...],
                 preferred_element_type=jnp.float32)

    # ---- bn2 shift + residual add + ReLU; single lane-dense f32 store ----
    o_ref[0] = jnp.maximum(acc2 + b2_ref[...] + sc + bs_ref[...], 0.0)


# ---------------------------------------------------------------------------
# Wrapper glue
# ---------------------------------------------------------------------------
def _space_to_depth_pad(x_nhwc, stride):
    """Spatially pad by 1 and phase-decompose so every conv tap (and the 1x1
    strided shortcut) becomes a *contiguous* static slice inside the kernel.

    Returns (N*s*s, Hq, Wq, C) with phases[n*s*s + a*s + b, i, j] = xpad[n, s*i+a, s*j+b].
    """
    N, H, W, C = x_nhwc.shape
    s = stride
    Hp, Wp = H + 2, W + 2
    Hq, Wq = -(-Hp // s), -(-Wp // s)
    xp = jnp.pad(x_nhwc, ((0, 0), (1, 1 + s * Hq - Hp), (1, 1 + s * Wq - Wp), (0, 0)))
    xp = xp.reshape(N, Hq, s, Wq, s, C)
    xp = jnp.transpose(xp, (0, 2, 4, 1, 3, 5))        # (N, a, b, Hq, Wq, C)
    return xp.reshape(N * s * s, Hq, Wq, C), Hq, Wq


def fold_bn(gamma, beta, mean, var, eps=1e-5):
    scale = gamma / jnp.sqrt(var + eps)
    shift = beta - mean * scale
    return scale, shift


def prepare_kernel_params(raw, in_planes, planes):
    """Fold BN scale into conv weights, pad output channels to a multiple of
    128 (lane-dense), cast weights to bf16, shifts stay f32."""
    Cp = max(128, ((planes + 127) // 128) * 128)
    s1, b1 = fold_bn(*raw["bn1"])
    s2, b2 = fold_bn(*raw["bn2"])

    def padc(a):  # pad last (output-channel) axis to Cp with zeros
        return jnp.pad(a, [(0, 0)] * (a.ndim - 1) + [(0, Cp - a.shape[-1])])

    # OIHW -> (kh*3+kw, Cin, Cout), BN scale folded into the output columns.
    w1 = jnp.transpose(raw["w1"], (2, 3, 1, 0)).reshape(9, in_planes, planes) * s1
    w2 = jnp.transpose(raw["w2"], (2, 3, 1, 0)).reshape(9, planes, planes) * s2
    w2 = jnp.pad(w2, ((0, 0), (0, Cp - planes), (0, 0)))   # pad conv2 input rows too

    if raw["ws"] is not None:
        ss, bs = fold_bn(*raw["bns"])
        ws = jnp.transpose(raw["ws"][:, :, 0, 0]) * ss      # (Cin, Cout), scale folded
    else:
        # Identity shortcut (stride == 1 and in_planes == planes): x @ I.
        ws = jnp.eye(in_planes, planes, dtype=jnp.float32)
        bs = jnp.zeros((planes,), jnp.float32)

    return {
        "w1": padc(w1).astype(jnp.bfloat16),
        "w2": padc(w2).astype(jnp.bfloat16),
        "ws": padc(ws).astype(jnp.bfloat16),
        "b1": padc(b1).reshape(1, Cp).astype(jnp.float32),
        "b2": padc(b2).reshape(1, Cp).astype(jnp.float32),
        "bs": padc(bs).reshape(1, Cp).astype(jnp.float32),
    }


def basic_block_forward(x_nchw, kp, *, stride, planes):
    x = jnp.transpose(x_nchw, (0, 2, 3, 1))               # NCHW -> NHWC (once per block)
    N, H, W, Cin = x.shape
    s = stride
    Ho = (H - 1) // s + 1
    Wo = (W - 1) // s + 1
    Cp = kp["w1"].shape[-1]

    xph, Hq, Wq = _space_to_depth_pad(x.astype(jnp.bfloat16), s)

    out = pl.pallas_call(
        functools.partial(_basic_block_kernel, stride=s, Ho=Ho, Wo=Wo),
        out_shape=jax.ShapeDtypeStruct((N, Ho * Wo, Cp), jnp.float32),
        grid=(N,),
        in_specs=[
            pl.BlockSpec((s * s, Hq, Wq, Cin), lambda n: (n, 0, 0, 0)),  # input phases
            pl.BlockSpec((9, Cin, Cp), lambda n: (0, 0, 0)),             # w1 (scaled)
            pl.BlockSpec((1, Cp), lambda n: (0, 0)),                     # bn1 shift
            pl.BlockSpec((9, Cp, Cp), lambda n: (0, 0, 0)),              # w2 (scaled)
            pl.BlockSpec((1, Cp), lambda n: (0, 0)),                     # bn2 shift
            pl.BlockSpec((Cin, Cp), lambda n: (0, 0)),                   # shortcut weight
            pl.BlockSpec((1, Cp), lambda n: (0, 0)),                     # shortcut shift
        ],
        out_specs=pl.BlockSpec((1, Ho * Wo, Cp), lambda n: (n, 0, 0)),
        scratch_shapes=[pltpu.VMEM((Ho + 2, Wo + 2, Cp), jnp.bfloat16)],  # conv1->conv2 stage
        compiler_params=pltpu.CompilerParams(
            dimension_semantics=("parallel",),
            vmem_limit_bytes=32 * 1024 * 1024,
        ),
    )(xph, kp["w1"], kp["b1"], kp["w2"], kp["b2"], kp["ws"], kp["bs"])

    out = out.reshape(N, Ho, Wo, Cp)[..., :planes]
    return jnp.transpose(out, (0, 3, 1, 2))               # back to NCHW


# ---------------------------------------------------------------------------
# Pure-JAX reference (f32) for correctness check
# ---------------------------------------------------------------------------
def reference_forward(x_nchw, raw, stride):
    x = jnp.transpose(x_nchw, (0, 2, 3, 1))
    dn = ("NHWC", "HWIO", "NHWC")

    def conv(inp, w_oihw, s, pad):
        w = jnp.transpose(w_oihw, (2, 3, 1, 0))
        return jax.lax.conv_general_dilated(
            inp, w, (s, s), [(pad, pad), (pad, pad)], dimension_numbers=dn)

    s1, b1 = fold_bn(*raw["bn1"])
    s2, b2 = fold_bn(*raw["bn2"])
    o = jnp.maximum(conv(x, raw["w1"], stride, 1) * s1 + b1, 0.0)
    o2 = conv(o, raw["w2"], 1, 1) * s2 + b2
    if raw["ws"] is not None:
        ss, bs = fold_bn(*raw["bns"])
        sc = conv(x, raw["ws"], stride, 0) * ss + bs
    else:
        sc = x
    out = jnp.maximum(o2 + sc, 0.0)
    return jnp.transpose(out, (0, 3, 1, 2))


# ---------------------------------------------------------------------------
def make_raw_params(key, in_planes, planes, stride):
    ks = jax.random.split(key, 8)
    w1 = 0.1 * jax.random.normal(ks[0], (planes, in_planes, 3, 3), jnp.float32)
    w2 = 0.1 * jax.random.normal(ks[1], (planes, planes, 3, 3), jnp.float32)

    def bn(k, c):
        k1, k2, k3, k4 = jax.random.split(k, 4)
        gamma = 1.0 + 0.1 * jax.random.normal(k1, (c,), jnp.float32)
        beta = 0.1 * jax.random.normal(k2, (c,), jnp.float32)
        mean = 0.05 * jax.random.normal(k3, (c,), jnp.float32)
        var = jax.random.uniform(k4, (c,), jnp.float32, minval=0.5, maxval=1.5)
        return (gamma, beta, mean, var)

    raw = {"w1": w1, "bn1": bn(ks[2], planes), "w2": w2, "bn2": bn(ks[3], planes),
           "ws": None, "bns": None}
    if stride != 1 or in_planes != planes:     # expansion == 1
        raw["ws"] = 0.1 * jax.random.normal(ks[4], (planes, in_planes, 1, 1), jnp.float32)
        raw["bns"] = bn(ks[5], planes)
    return raw


if __name__ == "__main__":
    key = jax.random.PRNGKey(0)
    kx, kparam = jax.random.split(key)

    # BasicBlock(in_planes=4, planes=8, stride=2) -> conv shortcut path active
    N, Cin, H, W = 2, 4, 16, 16
    planes, stride = 8, 2

    x = jax.random.normal(kx, (N, Cin, H, W), jnp.float32)
    raw = make_raw_params(kparam, Cin, planes, stride)
    kp = prepare_kernel_params(raw, Cin, planes)

    fwd = jax.jit(functools.partial(basic_block_forward, stride=stride, planes=planes))
    out = jax.block_until_ready(fwd(x, kp))
    ref = jax.block_until_ready(reference_forward(x, raw, stride))

    assert out.shape == (N, planes, H // stride, W // stride), out.shape
    assert bool(jnp.all(jnp.isfinite(out)))
    err = float(jnp.max(jnp.abs(out - ref)))
    # bf16 inputs/weights with f32 accumulation -> loosened tolerance
    assert jnp.allclose(out, ref, atol=5e-2, rtol=5e-2), err

    print("KERNEL_OK")
</pallas_src>

<mosaic_0001>
module attributes {stable_mosaic.version = 11 : i64} {
  func.func @_basic_block_kernel(%arg0: i32, %arg1: memref<4x9x9x4xbf16, #tpu.memory_space<vmem>>, %arg2: memref<9x4x128xbf16, #tpu.memory_space<vmem>>, %arg3: memref<1x128xf32, #tpu.memory_space<vmem>>, %arg4: memref<9x128x128xbf16, #tpu.memory_space<vmem>>, %arg5: memref<1x128xf32, #tpu.memory_space<vmem>>, %arg6: memref<4x128xbf16, #tpu.memory_space<vmem>>, %arg7: memref<1x128xf32, #tpu.memory_space<vmem>>, %arg8: memref<1x64x128xf32, #tpu.memory_space<vmem>>, %arg9: memref<10x10x128xbf16, #tpu.memory_space<vmem>>) attributes {dimension_semantics = [#tpu.dimension_semantics<parallel>], iteration_bounds = array<i64: 2>, scalar_prefetch = 0 : i64, scratch_operands = 1 : i64, tpu.core_type = #tpu.core_type<tc>, window_params = [{transform_indices = @transform_0, window_bounds = array<i64: 4, 9, 9, 4>}, {pipeline_mode = #tpu.pipeline_mode<synchronous>, transform_indices = @transform_1, window_bounds = array<i64: 9, 4, 128>}, {pipeline_mode = #tpu.pipeline_mode<synchronous>, transform_indices = @transform_2, window_bounds = array<i64: 1, 128>}, {pipeline_mode = #tpu.pipeline_mode<synchronous>, transform_indices = @transform_3, window_bounds = array<i64: 9, 128, 128>}, {pipeline_mode = #tpu.pipeline_mode<synchronous>, transform_indices = @transform_4, window_bounds = array<i64: 1, 128>}, {pipeline_mode = #tpu.pipeline_mode<synchronous>, transform_indices = @transform_5, window_bounds = array<i64: 4, 128>}, {pipeline_mode = #tpu.pipeline_mode<synchronous>, transform_indices = @transform_6, window_bounds = array<i64: 1, 128>}, {transform_indices = @transform_7, window_bounds = array<i64: 1, 64, 128>}]} {
    %cst = arith.constant 0.000000e+00 : f32
    %0 = vector.broadcast %cst : f32 to vector<64x128xf32>
    %c0 = arith.constant 0 : index
    %c0_0 = arith.constant 0 : index
    %c0_1 = arith.constant 0 : index
    %c0_2 = arith.constant 0 : index
    %1 = vector.load %arg1[%c0, %c0_0, %c0_1, %c0_2] : memref<4x9x9x4xbf16, #tpu.memory_space<vmem>>, vector<1x8x8x4xbf16>
    %2 = vector.shape_cast %1 : vector<1x8x8x4xbf16> to vector<8x8x4xbf16>
    %3 = vector.shape_cast %2 : vector<8x8x4xbf16> to vector<64x4xbf16>
    %c0_3 = arith.constant 0 : index
    %c0_4 = arith.constant 0 : index
    %c0_5 = arith.constant 0 : index
    %4 = vector.load %arg2[%c0_3, %c0_4, %c0_5] : memref<9x4x128xbf16, #tpu.memory_space<vmem>>, vector<1x4x128xbf16>
    %5 = vector.shape_cast %4 : vector<1x4x128xbf16> to vector<4x128xbf16>
    %cst_6 = arith.constant dense<0.000000e+00> : vector<64x128xf32>
    %6 = tpu.matmul %3, %5, %cst_6 {dimension_numbers = #tpu.dot_dimension_numbers<[1], [0], [0], [1], [0, 0, 1, 1], [], []>} : vector<64x4xbf16>, vector<4x128xbf16>, vector<64x128xf32> -> vector<64x128xf32>
    %7 = arith.addf %0, %6 : vector<64x128xf32>
    %c1 = arith.constant 1 : index
    %c0_7 = arith.constant 0 : index
    %c0_8 = arith.constant 0 : index
    %c0_9 = arith.constant 0 : index
    %8 = vector.load %arg1[%c1, %c0_7, %c0_8, %c0_9] : memref<4x9x9x4xbf16, #tpu.memory_space<vmem>>, vector<1x8x8x4xbf16>
    %9 = vector.shape_cast %8 : vector<1x8x8x4xbf16> to vector<8x8x4xbf16>
    %10 = vector.shape_cast %9 : vector<8x8x4xbf16> to vector<64x4xbf16>
    %c1_10 = arith.constant 1 : index
    %c0_11 = arith.constant 0 : index
    %c0_12 = arith.constant 0 : index
    %11 = vector.load %arg2[%c1_10, %c0_11, %c0_12] : memref<9x4x128xbf16, #tpu.memory_space<vmem>>, vector<1x4x128xbf16>
    %12 = vector.shape_cast %11 : vector<1x4x128xbf16> to vector<4x128xbf16>
    %cst_13 = arith.constant dense<0.000000e+00> : vector<64x128xf32>
    %13 = tpu.matmul %10, %12, %cst_13 {dimension_numbers = #tpu.dot_dimension_numbers<[1], [0], [0], [1], [0, 0, 1, 1], [], []>} : vector<64x4xbf16>, vector<4x128xbf16>, vector<64x128xf32> -> vector<64x128xf32>
    %14 = arith.addf %7, %13 : vector<64x128xf32>
    %c0_14 = arith.constant 0 : index
    %c0_15 = arith.constant 0 : index
    %c1_16 = arith.constant 1 : index
    %c0_17 = arith.constant 0 : index
    %15 = vector.load %arg1[%c0_14, %c0_15, %c1_16, %c0_17] : memref<4x9x9x4xbf16, #tpu.memory_space<vmem>>, vector<1x8x8x4xbf16>
    %16 = vector.shape_cast %15 : vector<1x8x8x4xbf16> to vector<8x8x4xbf16>
    %17 = vector.shape_cast %16 : vector<8x8x4xbf16> to vector<64x4xbf16>
    %c2 = arith.constant 2 : index
    %c0_18 = arith.constant 0 : index
    %c0_19 = arith.constant 0 : index
    %18 = vector.load %arg2[%c2, %c0_18, %c0_19] : memref<9x4x128xbf16, #tpu.memory_space<vmem>>, vector<1x4x128xbf16>
    %19 = vector.shape_cast %18 : vector<1x4x128xbf16> to vector<4x128xbf16>
    %cst_20 = arith.constant dense<0.000000e+00> : vector<64x128xf32>
    %20 = tpu.matmul %17, %19, %cst_20 {dimension_numbers = #tpu.dot_dimension_numbers<[1], [0], [0], [1], [0, 0, 1, 1], [], []>} : vector<64x4xbf16>, vector<4x128xbf16>, vector<64x128xf32> -> vector<64x128xf32>
    %21 = arith.addf %14, %20 : vector<64x128xf32>
    %c2_21 = arith.constant 2 : index
    %c0_22 = arith.constant 0 : index
    %c0_23 = arith.constant 0 : index
    %c0_24 = arith.constant 0 : index
    %22 = vector.load %arg1[%c2_21, %c0_22, %c0_23, %c0_24] : memref<4x9x9x4xbf16, #tpu.memory_space<vmem>>, vector<1x8x8x4xbf16>
    %23 = vector.shape_cast %22 : vector<1x8x8x4xbf16> to vector<8x8x4xbf16>
    %24 = vector.shape_cast %23 : vector<8x8x4xbf16> to vector<64x4xbf16>
    %c3 = arith.constant 3 : index
    %c0_25 = arith.constant 0 : index
    %c0_26 = arith.constant 0 : index
    %25 = vector.load %arg2[%c3, %c0_25, %c0_26] : memref<9x4x128xbf16, #tpu.memory_space<vmem>>, vector<1x4x128xbf16>
    %26 = vector.shape_cast %25 : vector<1x4x128xbf16> to vector<4x128xbf16>
    %cst_27 = arith.constant dense<0.000000e+00> : vector<64x128xf32>
    %27 = tpu.matmul %24, %26, %cst_27 {dimension_numbers = #tpu.dot_dimension_numbers<[1], [0], [0], [1], [0, 0, 1, 1], [], []>} : vector<64x4xbf16>, vector<4x128xbf16>, vector<64x128xf32> -> vector<64x128xf32>
    %28 = arith.addf %21, %27 : vector<64x128xf32>
    %c3_28 = arith.constant 3 : index
    %c0_29 = arith.constant 0 : index
    %c0_30 = arith.constant 0 : index
    %c0_31 = arith.constant 0 : index
    %29 = vector.load %arg1[%c3_28, %c0_29, %c0_30, %c0_31] : memref<4x9x9x4xbf16, #tpu.memory_space<vmem>>, vector<1x8x8x4xbf16>
    %30 = vector.shape_cast %29 : vector<1x8x8x4xbf16> to vector<8x8x4xbf16>
    %31 = vector.shape_cast %30 : vector<8x8x4xbf16> to vector<64x4xbf16>
    %c4 = arith.constant 4 : index
    %c0_32 = arith.constant 0 : index
    %c0_33 = arith.constant 0 : index
    %32 = vector.load %arg2[%c4, %c0_32, %c0_33] : memref<9x4x128xbf16, #tpu.memory_space<vmem>>, vector<1x4x128xbf16>
    %33 = vector.shape_cast %32 : vector<1x4x128xbf16> to vector<4x128xbf16>
    %cst_34 = arith.constant dense<0.000000e+00> : vector<64x128xf32>
    %34 = tpu.matmul %31, %33, %cst_34 {dimension_numbers = #tpu.dot_dimension_numbers<[1], [0], [0], [1], [0, 0, 1, 1], [], []>} : vector<64x4xbf16>, vector<4x128xbf16>, vector<64x128xf32> -> vector<64x128xf32>
    %35 = arith.addf %28, %34 : vector<64x128xf32>
    %c2_35 = arith.constant 2 : index
    %c0_36 = arith.constant 0 : index
    %c1_37 = arith.constant 1 : index
    %c0_38 = arith.constant 0 : index
    %36 = vector.load %arg1[%c2_35, %c0_36, %c1_37, %c0_38] : memref<4x9x9x4xbf16, #tpu.memory_space<vmem>>, vector<1x8x8x4xbf16>
    %37 = vector.shape_cast %36 : vector<1x8x8x4xbf16> to vector<8x8x4xbf16>
    %38 = vector.shape_cast %37 : vector<8x8x4xbf16> to vector<64x4xbf16>
    %c5 = arith.constant 5 : index
    %c0_39 = arith.constant 0 : index
    %c0_40 = arith.constant 0 : index
    %39 = vector.load %arg2[%c5, %c0_39, %c0_40] : memref<9x4x128xbf16, #tpu.memory_space<vmem>>, vector<1x4x128xbf16>
    %40 = vector.shape_cast %39 : vector<1x4x128xbf16> to vector<4x128xbf16>
    %cst_41 = arith.constant dense<0.000000e+00> : vector<64x128xf32>
    %41 = tpu.matmul %38, %40, %cst_41 {dimension_numbers = #tpu.dot_dimension_numbers<[1], [0], [0], [1], [0, 0, 1, 1], [], []>} : vector<64x4xbf16>, vector<4x128xbf16>, vector<64x128xf32> -> vector<64x128xf32>
    %42 = arith.addf %35, %41 : vector<64x128xf32>
    %c0_42 = arith.constant 0 : index
    %c1_43 = arith.constant 1 : index
    %c0_44 = arith.constant 0 : index
    %c0_45 = arith.constant 0 : index
    %43 = vector.load %arg1[%c0_42, %c1_43, %c0_44, %c0_45] : memref<4x9x9x4xbf16, #tpu.memory_space<vmem>>, vector<1x8x8x4xbf16>
    %44 = vector.shape_cast %43 : vector<1x8x8x4xbf16> to vector<8x8x4xbf16>
    %45 = vector.shape_cast %44 : vector<8x8x4xbf16> to vector<64x4xbf16>
    %c6 = arith.constant 6 : index
    %c0_46 = arith.constant 0 : index
    %c0_47 = arith.constant 0 : index
    %46 = vector.load %arg2[%c6, %c0_46, %c0_47] : memref<9x4x128xbf16, #tpu.memory_space<vmem>>, vector<1x4x128xbf16>
    %47 = vector.shape_cast %46 : vector<1x4x128xbf16> to vector<4x128xbf16>
    %cst_48 = arith.constant dense<0.000000e+00> : vector<64x128xf32>
    %48 = tpu.matmul %45, %47, %cst_48 {dimension_numbers = #tpu.dot_dimension_numbers<[1], [0], [0], [1], [0, 0, 1, 1], [], []>} : vector<64x4xbf16>, vector<4x128xbf16>, vector<64x128xf32> -> vector<64x128xf32>
    %49 = arith.addf %42, %48 : vector<64x128xf32>
    %c1_49 = arith.constant 1 : index
    %c1_50 = arith.constant 1 : index
    %c0_51 = arith.constant 0 : index
    %c0_52 = arith.constant 0 : index
    %50 = vector.load %arg1[%c1_49, %c1_50, %c0_51, %c0_52] : memref<4x9x9x4xbf16, #tpu.memory_space<vmem>>, vector<1x8x8x4xbf16>
    %51 = vector.shape_cast %50 : vector<1x8x8x4xbf16> to vector<8x8x4xbf16>
    %52 = vector.shape_cast %51 : vector<8x8x4xbf16> to vector<64x4xbf16>
    %c7 = arith.constant 7 : index
    %c0_53 = arith.constant 0 : index
    %c0_54 = arith.constant 0 : index
    %53 = vector.load %arg2[%c7, %c0_53, %c0_54] : memref<9x4x128xbf16, #tpu.memory_space<vmem>>, vector<1x4x128xbf16>
    %54 = vector.shape_cast %53 : vector<1x4x128xbf16> to vector<4x128xbf16>
    %cst_55 = arith.constant dense<0.000000e+00> : vector<64x128xf32>
    %55 = tpu.matmul %52, %54, %cst_55 {dimension_numbers = #tpu.dot_dimension_numbers<[1], [0], [0], [1], [0, 0, 1, 1], [], []>} : vector<64x4xbf16>, vector<4x128xbf16>, vector<64x128xf32> -> vector<64x128xf32>
    %56 = arith.addf %49, %55 : vector<64x128xf32>
    %c0_56 = arith.constant 0 : index
    %c1_57 = arith.constant 1 : index
    %c1_58 = arith.constant 1 : index
    %c0_59 = arith.constant 0 : index
    %57 = vector.load %arg1[%c0_56, %c1_57, %c1_58, %c0_59] : memref<4x9x9x4xbf16, #tpu.memory_space<vmem>>, vector<1x8x8x4xbf16>
    %58 = vector.shape_cast %57 : vector<1x8x8x4xbf16> to vector<8x8x4xbf16>
    %59 = vector.shape_cast %58 : vector<8x8x4xbf16> to vector<64x4xbf16>
    %c8 = arith.constant 8 : index
    %c0_60 = arith.constant 0 : index
    %c0_61 = arith.constant 0 : index
    %60 = vector.load %arg2[%c8, %c0_60, %c0_61] : memref<9x4x128xbf16, #tpu.memory_space<vmem>>, vector<1x4x128xbf16>
    %61 = vector.shape_cast %60 : vector<1x4x128xbf16> to vector<4x128xbf16>
    %cst_62 = arith.constant dense<0.000000e+00> : vector<64x128xf32>
    %62 = tpu.matmul %59, %61, %cst_62 {dimension_numbers = #tpu.dot_dimension_numbers<[1], [0], [0], [1], [0, 0, 1, 1], [], []>} : vector<64x4xbf16>, vector<4x128xbf16>, vector<64x128xf32> -> vector<64x128xf32>
    %63 = arith.addf %56, %62 : vector<64x128xf32>
    %c0_63 = arith.constant 0 : index
    %c0_64 = arith.constant 0 : index
    %64 = vector.load %arg3[%c0_63, %c0_64] : memref<1x128xf32, #tpu.memory_space<vmem>>, vector<1x128xf32>
    %65 = vector.broadcast %64 : vector<1x128xf32> to vector<64x128xf32>
    %66 = arith.addf %63, %65 : vector<64x128xf32>
    %cst_65 = arith.constant 0.000000e+00 : f32
    %67 = vector.broadcast %cst_65 : f32 to vector<64x128xf32>
    %68 = arith.maximumf %66, %67 : vector<64x128xf32>
    %cst_66 = arith.constant 0.000000e+00 : bf16
    %69 = vector.broadcast %cst_66 : bf16 to vector<10x10x128xbf16>
    %c0_67 = arith.constant 0 : index
    %c0_68 = arith.constant 0 : index
    %c0_69 = arith.constant 0 : index
    %70 = vector.load %arg9[%c0_67, %c0_68, %c0_69] : memref<10x10x128xbf16, #tpu.memory_space<vmem>>, vector<10x10x128xbf16>
    tpu.vector_store %arg9[%c0_67, %c0_68, %c0_69], %69 {strides = array<i32>} : memref<10x10x128xbf16, #tpu.memory_space<vmem>>, vector<10x10x128xbf16>,
    %71 = vector.shape_cast %68 : vector<64x128xf32> to vector<8x8x128xf32>
    %72 = arith.truncf %71 : vector<8x8x128xf32> to vector<8x8x128xbf16>
    %c1_70 = arith.constant 1 : index
    %c1_71 = arith.constant 1 : index
    %c0_72 = arith.constant 0 : index
    %73 = vector.load %arg9[%c1_70, %c1_71, %c0_72] : memref<10x10x128xbf16, #tpu.memory_space<vmem>>, vector<8x8x128xbf16>
    tpu.vector_store %arg9[%c1_70, %c1_71, %c0_72], %72 {strides = array<i32>} : memref<10x10x128xbf16, #tpu.memory_space<vmem>>, vector<8x8x128xbf16>,
    %cst_73 = arith.constant 0.000000e+00 : f32
    %74 = vector.broadcast %cst_73 : f32 to vector<64x128xf32>
    %c0_74 = arith.constant 0 : index
    %c0_75 = arith.constant 0 : index
    %c0_76 = arith.constant 0 : index
    %75 = vector.load %arg9[%c0_74, %c0_75, %c0_76] : memref<10x10x128xbf16, #tpu.memory_space<vmem>>, vector<8x8x128xbf16>
    %76 = vector.shape_cast %75 : vector<8x8x128xbf16> to vector<64x128xbf16>
    %c0_77 = arith.constant 0 : index
    %c0_78 = arith.constant 0 : index
    %c0_79 = arith.constant 0 : index
    %77 = vector.load %arg4[%c0_77, %c0_78, %c0_79] : memref<9x128x128xbf16, #tpu.memory_space<vmem>>, vector<1x128x128xbf16>
    %78 = vector.shape_cast %77 : vector<1x128x128xbf16> to vector<128x128xbf16>
    %cst_80 = arith.constant dense<0.000000e+00> : vector<64x128xf32>
    %79 = tpu.matmul %76, %78, %cst_80 {dimension_numbers = #tpu.dot_dimension_numbers<[1], [0], [0], [1], [0, 0, 1, 1], [], []>} : vector<64x128xbf16>, vector<128x128xbf16>, vector<64x128xf32> -> vector<64x128xf32>
    %80 = arith.addf %74, %79 : vector<64x128xf32>
    %c0_81 = arith.constant 0 : index
    %c1_82 = arith.constant 1 : index
    %c0_83 = arith.constant 0 : index
    %81 = vector.load %arg9[%c0_81, %c1_82, %c0_83] : memref<10x10x128xbf16, #tpu.memory_space<vmem>>, vector<8x8x128xbf16>
    %82 = vector.shape_cast %81 : vector<8x8x128xbf16> to vector<64x128xbf16>
    %c1_84 = arith.constant 1 : index
    %c0_85 = arith.constant 0 : index
    %c0_86 = arith.constant 0 : index
    %83 = vector.load %arg4[%c1_84, %c0_85, %c0_86] : memref<9x128x128xbf16, #tpu.memory_space<vmem>>, vector<1x128x128xbf16>
    %84 = vector.shape_cast %83 : vector<1x128x128xbf16> to vector<128x128xbf16>
    %cst_87 = arith.constant dense<0.000000e+00> : vector<64x128xf32>
    %85 = tpu.matmul %82, %84, %cst_87 {dimension_numbers = #tpu.dot_dimension_numbers<[1], [0], [0], [1], [0, 0, 1, 1], [], []>} : vector<64x128xbf16>, vector<128x128xbf16>, vector<64x128xf32> -> vector<64x128xf32>
    %86 = arith.addf %80, %85 : vector<64x128xf32>
    %c0_88 = arith.constant 0 : index
    %c2_89 = arith.constant 2 : index
    %c0_90 = arith.constant 0 : index
    %87 = vector.load %arg9[%c0_88, %c2_89, %c0_90] : memref<10x10x128xbf16, #tpu.memory_space<vmem>>, vector<8x8x128xbf16>
    %88 = vector.shape_cast %87 : vector<8x8x128xbf16> to vector<64x128xbf16>
    %c2_91 = arith.constant 2 : index
    %c0_92 = arith.constant 0 : index
    %c0_93 = arith.constant 0 : index
    %89 = vector.load %arg4[%c2_91, %c0_92, %c0_93] : memref<9x128x128xbf16, #tpu.memory_space<vmem>>, vector<1x128x128xbf16>
    %90 = vector.shape_cast %89 : vector<1x128x128xbf16> to vector<128x128xbf16>
    %cst_94 = arith.constant dense<0.000000e+00> : vector<64x128xf32>
    %91 = tpu.matmul %88, %90, %cst_94 {dimension_numbers = #tpu.dot_dimension_numbers<[1], [0], [0], [1], [0, 0, 1, 1], [], []>} : vector<64x128xbf16>, vector<128x128xbf16>, vector<64x128xf32> -> vector<64x128xf32>
    %92 = arith.addf %86, %91 : vector<64x128xf32>
    %c1_95 = arith.constant 1 : index
    %c0_96 = arith.constant 0 : index
    %c0_97 = arith.constant 0 : index
    %93 = vector.load %arg9[%c1_95, %c0_96, %c0_97] : memref<10x10x128xbf16, #tpu.memory_space<vmem>>, vector<8x8x128xbf16>
    %94 = vector.shape_cast %93 : vector<8x8x128xbf16> to vector<64x128xbf16>
    %c3_98 = arith.constant 3 : index
    %c0_99 = arith.constant 0 : index
    %c0_100 = arith.constant 0 : index
    %95 = vector.load %arg4[%c3_98, %c0_99, %c0_100] : memref<9x128x128xbf16, #tpu.memory_space<vmem>>, vector<1x128x128xbf16>
    %96 = vector.shape_cast %95 : vector<1x128x128xbf16> to vector<128x128xbf16>
    %cst_101 = arith.constant dense<0.000000e+00> : vector<64x128xf32>
    %97 = tpu.matmul %94, %96, %cst_101 {dimension_numbers = #tpu.dot_dimension_numbers<[1], [0], [0], [1], [0, 0, 1, 1], [], []>} : vector<64x128xbf16>, vector<128x128xbf16>, vector<64x128xf32> -> vector<64x128xf32>
    %98 = arith.addf %92, %97 : vector<64x128xf32>
    %c1_102 = arith.constant 1 : index
    %c1_103 = arith.constant 1 : index
    %c0_104 = arith.constant 0 : index
    %99 = vector.load %arg9[%c1_102, %c1_103, %c0_104] : memref<10x10x128xbf16, #tpu.memory_space<vmem>>, vector<8x8x128xbf16>
    %100 = vector.shape_cast %99 : vector<8x8x128xbf16> to vector<64x128xbf16>
    %c4_105 = arith.constant 4 : index
    %c0_106 = arith.constant 0 : index
    %c0_107 = arith.constant 0 : index
    %101 = vector.load %arg4[%c4_105, %c0_106, %c0_107] : memref<9x128x128xbf16, #tpu.memory_space<vmem>>, vector<1x128x128xbf16>
    %102 = vector.shape_cast %101 : vector<1x128x128xbf16> to vector<128x128xbf16>
    %cst_108 = arith.constant dense<0.000000e+00> : vector<64x128xf32>
    %103 = tpu.matmul %100, %102, %cst_108 {dimension_numbers = #tpu.dot_dimension_numbers<[1], [0], [0], [1], [0, 0, 1, 1], [], []>} : vector<64x128xbf16>, vector<128x128xbf16>, vector<64x128xf32> -> vector<64x128xf32>
    %104 = arith.addf %98, %103 : vector<64x128xf32>
    %c1_109 = arith.constant 1 : index
    %c2_110 = arith.constant 2 : index
    %c0_111 = arith.constant 0 : index
    %105 = vector.load %arg9[%c1_109, %c2_110, %c0_111] : memref<10x10x128xbf16, #tpu.memory_space<vmem>>, vector<8x8x128xbf16>
    %106 = vector.shape_cast %105 : vector<8x8x128xbf16> to vector<64x128xbf16>
    %c5_112 = arith.constant 5 : index
    %c0_113 = arith.constant 0 : index
    %c0_114 = arith.constant 0 : index
    %107 = vector.load %arg4[%c5_112, %c0_113, %c0_114] : memref<9x128x128xbf16, #tpu.memory_space<vmem>>, vector<1x128x128xbf16>
    %108 = vector.shape_cast %107 : vector<1x128x128xbf16> to vector<128x128xbf16>
    %cst_115 = arith.constant dense<0.000000e+00> : vector<64x128xf32>
    %109 = tpu.matmul %106, %108, %cst_115 {dimension_numbers = #tpu.dot_dimension_numbers<[1], [0], [0], [1], [0, 0, 1, 1], [], []>} : vector<64x128xbf16>, vector<128x128xbf16>, vector<64x128xf32> -> vector<64x128xf32>
    %110 = arith.addf %104, %109 : vector<64x128xf32>
    %c2_116 = arith.constant 2 : index
    %c0_117 = arith.constant 0 : index
    %c0_118 = arith.constant 0 : index
    %111 = vector.load %arg9[%c2_116, %c0_117, %c0_118] : memref<10x10x128xbf16, #tpu.memory_space<vmem>>, vector<8x8x128xbf16>
    %112 = vector.shape_cast %111 : vector<8x8x128xbf16> to vector<64x128xbf16>
    %c6_119 = arith.constant 6 : index
    %c0_120 = arith.constant 0 : index
    %c0_121 = arith.constant 0 : index
    %113 = vector.load %arg4[%c6_119, %c0_120, %c0_121] : memref<9x128x128xbf16, #tpu.memory_space<vmem>>, vector<1x128x128xbf16>
    %114 = vector.shape_cast %113 : vector<1x128x128xbf16> to vector<128x128xbf16>
    %cst_122 = arith.constant dense<0.000000e+00> : vector<64x128xf32>
    %115 = tpu.matmul %112, %114, %cst_122 {dimension_numbers = #tpu.dot_dimension_numbers<[1], [0], [0], [1], [0, 0, 1, 1], [], []>} : vector<64x128xbf16>, vector<128x128xbf16>, vector<64x128xf32> -> vector<64x128xf32>
    %116 = arith.addf %110, %115 : vector<64x128xf32>
    %c2_123 = arith.constant 2 : index
    %c1_124 = arith.constant 1 : index
    %c0_125 = arith.constant 0 : index
    %117 = vector.load %arg9[%c2_123, %c1_124, %c0_125] : memref<10x10x128xbf16, #tpu.memory_space<vmem>>, vector<8x8x128xbf16>
    %118 = vector.shape_cast %117 : vector<8x8x128xbf16> to vector<64x128xbf16>
    %c7_126 = arith.constant 7 : index
    %c0_127 = arith.constant 0 : index
    %c0_128 = arith.constant 0 : index
    %119 = vector.load %arg4[%c7_126, %c0_127, %c0_128] : memref<9x128x128xbf16, #tpu.memory_space<vmem>>, vector<1x128x128xbf16>
    %120 = vector.shape_cast %119 : vector<1x128x128xbf16> to vector<128x128xbf16>
    %cst_129 = arith.constant dense<0.000000e+00> : vector<64x128xf32>
    %121 = tpu.matmul %118, %120, %cst_129 {dimension_numbers = #tpu.dot_dimension_numbers<[1], [0], [0], [1], [0, 0, 1, 1], [], []>} : vector<64x128xbf16>, vector<128x128xbf16>, vector<64x128xf32> -> vector<64x128xf32>
    %122 = arith.addf %116, %121 : vector<64x128xf32>
    %c2_130 = arith.constant 2 : index
    %c2_131 = arith.constant 2 : index
    %c0_132 = arith.constant 0 : index
    %123 = vector.load %arg9[%c2_130, %c2_131, %c0_132] : memref<10x10x128xbf16, #tpu.memory_space<vmem>>, vector<8x8x128xbf16>
    %124 = vector.shape_cast %123 : vector<8x8x128xbf16> to vector<64x128xbf16>
    %c8_133 = arith.constant 8 : index
    %c0_134 = arith.constant 0 : index
    %c0_135 = arith.constant 0 : index
    %125 = vector.load %arg4[%c8_133, %c0_134, %c0_135] : memref<9x128x128xbf16, #tpu.memory_space<vmem>>, vector<1x128x128xbf16>
    %126 = vector.shape_cast %125 : vector<1x128x128xbf16> to vector<128x128xbf16>
    %cst_136 = arith.constant dense<0.000000e+00> : vector<64x128xf32>
    %127 = tpu.matmul %124, %126, %cst_136 {dimension_numbers = #tpu.dot_dimension_numbers<[1], [0], [0], [1], [0, 0, 1, 1], [], []>} : vector<64x128xbf16>, vector<128x128xbf16>, vector<64x128xf32> -> vector<64x128xf32>
    %128 = arith.addf %122, %127 : vector<64x128xf32>
    %c3_137 = arith.constant 3 : index
    %c0_138 = arith.constant 0 : index
    %c0_139 = arith.constant 0 : index
    %c0_140 = arith.constant 0 : index
    %129 = vector.load %arg1[%c3_137, %c0_138, %c0_139, %c0_140] : memref<4x9x9x4xbf16, #tpu.memory_space<vmem>>, vector<1x8x8x4xbf16>
    %130 = vector.shape_cast %129 : vector<1x8x8x4xbf16> to vector<8x8x4xbf16>
    %131 = vector.shape_cast %130 : vector<8x8x4xbf16> to vector<64x4xbf16>
    %c0_141 = arith.constant 0 : index
    %c0_142 = arith.constant 0 : index
    %132 = vector.load %arg6[%c0_141, %c0_142] : memref<4x128xbf16, #tpu.memory_space<vmem>>, vector<4x128xbf16>
    %cst_143 = arith.constant dense<0.000000e+00> : vector<64x128xf32>
    %133 = tpu.matmul %131, %132, %cst_143 {dimension_numbers = #tpu.dot_dimension_numbers<[1], [0], [0], [1], [0, 0, 1, 1], [], []>} : vector<64x4xbf16>, vector<4x128xbf16>, vector<64x128xf32> -> vector<64x128xf32>
    %c0_144 = arith.constant 0 : index
    %c0_145 = arith.constant 0 : index
    %134 = vector.load %arg5[%c0_144, %c0_145] : memref<1x128xf32, #tpu.memory_space<vmem>>, vector<1x128xf32>
    %135 = vector.broadcast %134 : vector<1x128xf32> to vector<64x128xf32>
    %136 = arith.addf %128, %135 : vector<64x128xf32>
    %137 = arith.addf %136, %133 : vector<64x128xf32>
    %c0_146 = arith.constant 0 : index
    %c0_147 = arith.constant 0 : index
    %138 = vector.load %arg7[%c0_146, %c0_147] : memref<1x128xf32, #tpu.memory_space<vmem>>, vector<1x128xf32>
    %139 = vector.broadcast %138 : vector<1x128xf32> to vector<64x128xf32>
    %140 = arith.addf %137, %139 : vector<64x128xf32>
    %cst_148 = arith.constant 0.000000e+00 : f32
    %141 = vector.broadcast %cst_148 : f32 to vector<64x128xf32>
    %142 = arith.maximumf %140, %141 : vector<64x128xf32>
    %c0_149 = arith.constant 0 : index
    %c0_150 = arith.constant 0 : index
    %c0_151 = arith.constant 0 : index
    %143 = vector.load %arg8[%c0_149, %c0_150, %c0_151] : memref<1x64x128xf32, #tpu.memory_space<vmem>>, vector<1x64x128xf32>
    %144 = vector.shape_cast %143 : vector<1x64x128xf32> to vector<64x128xf32>
    %145 = vector.shape_cast %142 : vector<64x128xf32> to vector<1x64x128xf32>
    tpu.vector_store %arg8[%c0_149, %c0_150, %c0_151], %145 {strides = array<i32>} : memref<1x64x128xf32, #tpu.memory_space<vmem>>, vector<1x64x128xf32>,
    return
  }
  func.func @transform_0(%arg0: i32) -> (i32, i32, i32, i32) {
    %c0_i32 = arith.constant 0 : i32
    %c0_i32_0 = arith.constant 0 : i32
    %c0_i32_1 = arith.constant 0 : i32
    %c0_i32_2 = arith.constant 0 : i32
    return %arg0, %c0_i32, %c0_i32_0, %c0_i32_1 : i32, i32, i32, i32
  }
  func.func @transform_1(%arg0: i32) -> (i32, i32, i32) {
    %c0_i32 = arith.constant 0 : i32
    %c0_i32_0 = arith.constant 0 : i32
    %c0_i32_1 = arith.constant 0 : i32
    %c0_i32_2 = arith.constant 0 : i32
    return %c0_i32, %c0_i32_0, %c0_i32_1 : i32, i32, i32
  }
  func.func @transform_2(%arg0: i32) -> (i32, i32) {
    %c0_i32 = arith.constant 0 : i32
    %c0_i32_0 = arith.constant 0 : i32
    %c0_i32_1 = arith.constant 0 : i32
    return %c0_i32, %c0_i32_0 : i32, i32
  }
  func.func @transform_3(%arg0: i32) -> (i32, i32, i32) {
    %c0_i32 = arith.constant 0 : i32
    %c0_i32_0 = arith.constant 0 : i32
    %c0_i32_1 = arith.constant 0 : i32
    %c0_i32_2 = arith.constant 0 : i32
    return %c0_i32, %c0_i32_0, %c0_i32_1 : i32, i32, i32
  }
  func.func @transform_4(%arg0: i32) -> (i32, i32) {
    %c0_i32 = arith.constant 0 : i32
    %c0_i32_0 = arith.constant 0 : i32
    %c0_i32_1 = arith.constant 0 : i32
    return %c0_i32, %c0_i32_0 : i32, i32
  }
  func.func @transform_5(%arg0: i32) -> (i32, i32) {
    %c0_i32 = arith.constant 0 : i32
    %c0_i32_0 = arith.constant 0 : i32
    %c0_i32_1 = arith.constant 0 : i32
    return %c0_i32, %c0_i32_0 : i32, i32
  }
  func.func @transform_6(%arg0: i32) -> (i32, i32) {
    %c0_i32 = arith.constant 0 : i32
    %c0_i32_0 = arith.constant 0 : i32
    %c0_i32_1 = arith.constant 0 : i32
    return %c0_i32, %c0_i32_0 : i32, i32
  }
  func.func @transform_7(%arg0: i32) -> (i32, i32, i32) {
    %c0_i32 = arith.constant 0 : i32
    %c0_i32_0 = arith.constant 0 : i32
    %c0_i32_1 = arith.constant 0 : i32
    return %arg0, %c0_i32, %c0_i32_0 : i32, i32, i32
  }
}

</mosaic_0001>

<bundles_post_ra>
// kernel: basic_block_forward.1
= control target key start
LH: loop header
LB: loop body
LE: loop exit
PB: predicated region body
PF: predicated region fallthrough
CT: control target
= control target key end

     0   :  { %s5183_s24 = smov 0   ;;  %s6088_s0 = inlined_call_operand.vmem [shape: bf16[8,9,9,4], index: 0, kind: input, shape index: {}]   ;;  %s6089_s1 = inlined_call_operand.vmem [shape: bf16[9,4,128], index: 1, kind: input, shape index: {}]   ;;  %s6090_s2 = inlined_call_operand.vmem [shape: f32[1,128], index: 2, kind: input, shape index: {}]   ;;  %s6091_s3 = inlined_call_operand.vmem [shape: bf16[9,128,128], index: 3, kind: input, shape index: {}]   ;;  %s6092_s4 = inlined_call_operand.vmem [shape: f32[1,128], index: 4, kind: input, shape index: {}]   ;;  %s6093_s5 = inlined_call_operand.vmem [shape: bf16[4,128], index: 5, kind: input, shape index: {}]   ;;  %s6094_s6 = inlined_call_operand.vmem [shape: f32[1,128], index: 6, kind: input, shape index: {}]   ;;  %s6095_s7 = inlined_call_operand.vmem [shape: f32[2,64,128], index: 7, kind: output, shape index: {}]  }
   0x1 LB: > { %s5189_s25 = sadd.s32 4294967295, %s5140_s24   ;;  %p4073_p0 = scmp.ge.s32.totalorder %s5140_s24, 1  ;;  %s5140_s24 = sphi %s5183_s24, %s17_s24  }
   0x2   : > { %p239_p1 = scmp.lt.s32.totalorder %s5140_s24, 3 }
   0x4   : > { %p240_p2 = pnand %p4073_p0, %p239_p1 }
   0x6   : > { %243 = sbr.rel (%p240_p2) target bundleno = 672 (0x2a0), region = 48 }
   0xb   : > { %v4086_v0 = vld [vmem:[%s6089_s1 + $0x2] sm:$0x3]  ;;  %vm338_vm0 = vcmask 1041408   ;;  %v293_v1 = vld [vmem:[%s6089_s1] sm:$0x3]  ;;  %s4074_s30 = sshll.u32 %s5189_s25, 2 }
   0xc   : > { %5002 = vmatprep.subr.msk.bf16.mxu0 %vm338_vm0, %v4086_v0  ;;  %v340_v2 = vsel %vm338_vm0, %v4086_v0, 0  ;;  %5003 = vmatprep.subr.msk.bf16.mxu1 %vm338_vm0, %v293_v1  ;;  %v440_v3 = vsel %vm338_vm0, %v293_v1, 0  ;;  %p273_p3 = scmp.lt.s32.totalorder %s4074_s30, 7  ;;  %v4103_v4 = vld [vmem:[%s6089_s1 + $0x4] sm:$0x3]  ;;  %vm325_vm1 = vcmask 31744  }
   0xd   : > { %4687 = vmatpush3.bf16.msra.mxu0 %v340_v2  ;;  %4697 = vmatpush3.bf16.msra.mxu1 %v440_v3  ;;  %v4120_v5 = vld [vmem:[%s6089_s1 + $0x6] sm:$0x3]  ;;  %v4137_v6 = vld [vmem:[%s6089_s1 + $0x8] sm:$0x3]  ;;  %v4162_v7 = vld [vmem:[%s6089_s1 + $0xa] sm:$0x3] }
   0xe   : > { %s6123_s30 = smov (!%p273_p3, %s4074_s30), 7  ;;  %5004 = vmatprep.subr.msk.bf16.mxu0 %vm338_vm0, %v4103_v4  ;;  %5005 = vmatprep.subr.msk.bf16.mxu1 %vm338_vm0, %v4120_v5  ;;  %v665_v8 = vsel %vm338_vm0, %v4103_v4, 0  ;;  %v784_v9 = vsel %vm338_vm0, %v4120_v5, 0  ;;  %v5226_v10 = vsel %vm338_vm0, %v4137_v6, 0  ;;  %v5229_v11 = vsel %vm338_vm0, %v4162_v7, 0  ;;  %p279_p4 = scmp.lt.s32.totalorder %s5189_s25, 1 }
   0xf   : > { %s5012_s16 = smul.u32 72, %s6123_s30  ;;  %vm523_vm2 = vsmask.f32 3328  ;;  %vm524_vm3 = vsmask.f32 7440  ;;  %vm1832_vm5 = vcmask 1043456  }
  0x10   : > { %vm5259_vm4 = vmor %vm523_vm2, %vm524_vm3  ;;  %v5277_v5 = vld [vmem:[%s6089_s1 + $0xe] sm:$0x3]  ;;  %vm1833_vm6 = vsmask.f32 7938  ;;  %vm1838_vm7 = vcmask 1040384   ;;  %vm2337_vm11 = vcmask 1042432  }
  0x11   : > { %s5223_s19 = scalar_lea.vmem %s6088_s0, %s5012_s16  ;;  %vm1839_vm8 = vsmask.f32 256  ;;  %vm5533_vm9 = vmand %vm1832_vm5, %vm1833_vm6  ;;  %vm2338_vm12 = vcmask 1046532   ;;  %s6125_s25 = smov (!%p279_p4, %s5189_s25), 1 }
  0x12   : > { %v5022_v12 = vld [vmem:[%s5223_s19 + $0x48] ss:$8 sps:$4 sm:$0xff]   ;;  %v5024_v14 = vld [vmem:[%s5223_s19 + $0x58] ss:$8 sps:$4 sm:$0xff]   ;;  %v508_v21 = vld [vmem:[%s5223_s19 + $0x4] sm:$0x1] }
  0x13   : > { %v5023_v13 = vld [vmem:[%s5223_s19] ss:$8 sps:$4 sm:$0xff]   ;;  %4688 = vmatprep.mubr.msk.bf16.mxu0 %vm325_vm1, %v5022_v12  ;;  %v5025_v15 = vld [vmem:[%s5223_s19 + $0x10] ss:$8 sps:$4 sm:$0xff]   ;;  %v510_v23 = vld [vmem:[%s5223_s19 + $0xc] sm:$0x1] }
  0x14   : > { %4698 = vmatprep.mubr.msk.bf16.mxu1 %vm325_vm1, %v5023_v13  ;;  %4689 = vmatmul.mubr.msk.bf16.vlgmr.msra.gmra.mxu0 %vm325_vm1, %v5024_v14  ;;  %v5026_v16 = vld [vmem:[%s5223_s19 + $0x68] ss:$8 sps:$4 sm:$0xff]   ;;  %v5028_v18 = vld [vmem:[%s5223_s19 + $0x78] ss:$8 sps:$4 sm:$0xff]   ;;  %v536_v26 = vshll.u32 %v508_v21, 16  ;;  %v550_v29 = vshll.u32 %v510_v23, 16  ;;  %vm5539_vm10 = vmand %vm1838_vm7, %vm1839_vm8 }
  0x15   : > { %4699 = vmatmul.mubr.msk.bf16.vlgmr.msra.gmra.mxu1 %vm325_vm1, %v5025_v15  ;;  %4707 = vmatpush3.bf16.msra.mxu0 %v665_v8  ;;  %v5027_v17 = vld [vmem:[%s5223_s19 + $0x20] ss:$8 sps:$4 sm:$0xff]   ;;  %v5029_v19 = vld [vmem:[%s5223_s19 + $0x30] ss:$8 sps:$4 sm:$0xff]   ;;  %v512_v31 = vld [vmem:[%s5223_s19 + $0x14] sm:$0x1] }
  0x16   : > { %4692 = vmatprep.mubr.msk.bf16.mxu0 %vm325_vm1, %v5026_v16  ;;  %4717 = vmatpush3.bf16.msra.mxu1 %v784_v9  ;;  %v507_v20 = vld [vmem:[%s5223_s19] sm:$0xf]  ;;  %v509_v22 = vld [vmem:[%s5223_s19 + $0x8] sm:$0xf]  ;;  %v511_v30 = vld [vmem:[%s5223_s19 + $0x10] sm:$0xf] }
  0x17   : > { %4702 = vmatprep.mubr.msk.bf16.mxu1 %vm325_vm1, %v5027_v17  ;;  %5006 = vmatprep.subr.msk.bf16.mxu0 %vm338_vm0, %v4137_v6  ;;  %v527_v24 = vshrl.u32 %v507_v20, 16  ;;  %v530_v25 = vshll.u32 %v507_v20, 16  ;;  %v541_v27 = vshrl.u32 %v509_v22, 16  ;;  %v544_v28 = vshll.u32 %v509_v22, 16  ;;  %v513_v36 = vld [vmem:[%s5223_s19 + $0x18] sm:$0xf]  ;;  %vm5655_vm13 = vmor %vm2337_vm11, %vm2338_vm12 }
  0x18   : > { %5007 = vmatprep.subr.msk.bf16.mxu1 %vm338_vm0, %v4162_v7  ;;  %v538_v34 = vrot.slane %v536_v26, 5  ;;  %v552_v38 = vrot.slane %v550_v29, 5  ;;  %v514_v39 = vld [vmem:[%s5223_s19 + $0x1c] sm:$0x1]  ;;  %v555_v40 = vshrl.u32 %v511_v30, 16  ;;  %v558_v41 = vshll.u32 %v511_v30, 16 }
  0x19   : > { %v529_v32 = vrot.slane %v527_v24, 4  ;;  %v532_v33 = vrot.slane %v530_v25, 5  ;;  %v543_v35 = vrot.slane %v541_v27, 4  ;;  %v546_v37 = vrot.slane %v544_v28, 5  ;;  %v5030_v55 = vld [vmem:[%s5223_s19 + $0x90] ss:$8 sps:$4 sm:$0xff]  }
  0x1a   : > { %v564_v43 = vshll.u32 %v512_v31, 16  ;;  %v569_v44 = vshrl.u32 %v513_v36, 16  ;;  %v572_v45 = vshll.u32 %v513_v36, 16  ;;  %v557_v48 = vrot.slane %v555_v40, 4  ;;  %v5031_v61 = vld [vmem:[%s5223_s19 + $0xa0] ss:$8 sps:$4 sm:$0xff]  }
  0x1b   : > { %v533_v42 = vor.u32 %v532_v33, %v529_v32  ;;  %v547_v47 = vor.u32 %v546_v37, %v543_v35  ;;  %v560_v49 = vrot.slane %v558_v41, 5  ;;  %v578_v50 = vshll.u32 %v514_v39, 16  ;;  %v515_v62 = vld [vmem:[%s5223_s19 + $0x20] sm:$0xf]  ;;  %v516_v63 = vld [vmem:[%s5223_s19 + $0x24] sm:$0x1] }
  0x1c   : > { %4693 = vmatmul.mubr.msk.bf16.gmra.mxu0 %vm325_vm1, %v5028_v18  ;;  %v566_v52 = vrot.slane %v564_v43, 5  ;;  %v571_v53 = vrot.slane %v569_v44, 4  ;;  %v574_v54 = vrot.slane %v572_v45, 5  ;;  %v517_v2 = vld [vmem:[%s5223_s19 + $0x28] sm:$0xf]  ;;  %v583_v4 = vshrl.u32 %v515_v62, 16 }
  0x1d   : > { %4703 = vmatmul.mubr.msk.bf16.gmra.mxu1 %vm325_vm1, %v5029_v19  ;;  %v534_v51 = vrot.slane %v533_v42, 4  ;;  %v548_v56 = vrot.slane %v547_v47, 4  ;;  %v561_v57 = vor.u32 %v560_v49, %v557_v48  ;;  %v580_v58 = vrot.slane %v578_v50, 5  ;;  %v518_v3 = vld [vmem:[%s5223_s19 + $0x2c] sm:$0x1]  ;;  %s4519_s16 = sshll.u32 %s6125_s25, 6 }
  0x1e   : > { %v575_v60 = vor.u32 %v574_v54, %v571_v53  ;;  %4718 = vmatprep.mubr.msk.bf16.mxu1 %vm325_vm1, %v5030_v55  ;;  %v586_v8 = vshll.u32 %v515_v62, 16  ;;  %v592_v9 = vshll.u32 %v516_v63, 16  ;;  %v519_v12 = vld [vmem:[%s5223_s19 + $0x30] sm:$0xf]  ;;  %v585_v14 = vrot.slane %v583_v4, 4  ;;  %s6066_s25 = scalar_lea.vmem %s6095_s7, %s4519_s16 }
  0x1f   : > { %v539_v59 = vsel %vm5259_vm4, %v534_v51, %v538_v34  ;;  %v553_v0 = vsel %vm5259_vm4, %v548_v56, %v552_v38  ;;  %v562_v1 = vrot.slane %v561_v57, 4  ;;  %v597_v15 = vshrl.u32 %v517_v2, 16  ;;  %v520_v17 = vld [vmem:[%s5223_s19 + $0x34] sm:$0x1]  ;;  %v521_v22 = vld [vmem:[%s5223_s19 + $0x38] sm:$0xf] }
  0x20   : > { %v4104_v6 = vcombine.low %v539_v59, %v553_v0  ;;  %v576_v7 = vrot.slane %v575_v60, 4  ;;  %v600_v16 = vshll.u32 %v517_v2, 16  ;;  %v588_v19 = vrot.slane %v586_v8, 5  ;;  %v5291_v23 = vld [vmem:[%s6089_s1 + $0xc] sm:$0x3] }
  0x21   : > { %v567_v13 = vsel %vm5259_vm4, %v562_v1, %v566_v52  ;;  %v594_v20 = vrot.slane %v592_v9, 5  ;;  %v606_v21 = vshll.u32 %v518_v3, 16  ;;  %v599_v25 = vrot.slane %v597_v15, 4  ;;  %v522_v27 = vld [vmem:[%s5223_s19 + $0x3c] sm:$0x1] }
  0x22   : > { %4708 = vmatprep.mubr.msk.bf16.mxu0 %vm325_vm1, %v4104_v6  ;;  %v581_v18 = vsel %vm5259_vm4, %v576_v7, %v580_v58  ;;  %v602_v26 = vrot.slane %v600_v16, 5  ;;  %v611_v28 = vshrl.u32 %v519_v12, 16  ;;  %v589_v29 = vor.u32 %v588_v19, %v585_v14  ;;  %v5034_v53 = vld [vmem:[%s5223_s19 + $0xd8] ss:$8 sps:$4 sm:$0xff]   ;;  %v4146_v54 = vld [vmem:[%s5223_s19 + $0x90] sm:$0xf] }
  0x23   : > { %v4105_v24 = vcombine.low %v567_v13, %v581_v18  ;;  %v608_v30 = vrot.slane %v606_v21, 5  ;;  %v614_v31 = vshll.u32 %v519_v12, 16  ;;  %v620_v32 = vshll.u32 %v520_v17, 16  ;;  %v4147_v56 = vld [vmem:[%s5223_s19 + $0x94] sm:$0x1] }
  0x24   : > { %v603_v33 = vor.u32 %v602_v26, %v599_v25  ;;  %v613_v34 = vrot.slane %v611_v28, 4  ;;  %v625_v35 = vshrl.u32 %v521_v22, 16  ;;  %v628_v36 = vshll.u32 %v521_v22, 16  ;;  %v4148_v57 = vld [vmem:[%s5223_s19 + $0x98] sm:$0xf] }
  0x25   : > { %4719 = vmatmul.mubr.msk.bf16.vlgmr.msra.gmra.mxu1 %vm325_vm1, %v5031_v61  ;;  %4709 = vmatmul.mubr.msk.bf16.vlgmr.msra.gmra.mxu0 %vm325_vm1, %v4105_v24  ;;  %v590_v37 = vrot.slane %v589_v29, 4  ;;  %v616_v38 = vrot.slane %v614_v31, 5  ;;  %v634_v39 = vshll.u32 %v522_v27, 16  ;;  %v622_v45 = vrot.slane %v620_v32, 5  ;;  %v4149_v58 = vld [vmem:[%s5223_s19 + $0x9c] sm:$0x1] }
  0x26   : > { %4737 = vmatpush3.bf16.msra.mxu1 %v5229_v11  ;;  %4727 = vmatpush3.bf16.msra.mxu0 %v5226_v10  ;;  %v5032_v11 = vld [vmem:[%s5223_s19 + $0xb0] ss:$8 sps:$4 sm:$0xff]   ;;  %v604_v40 = vrot.slane %v603_v33, 4  ;;  %v627_v41 = vrot.slane %v625_v35, 4  ;;  %v630_v42 = vrot.slane %v628_v36, 5  ;;  %v995_v60 = vshrl.u32 %v4146_v54, 16 }
  0x27   : > { %5009 = vmatprep.subr.msk.bf16.mxu1 %vm338_vm0, %v5277_v5  ;;  %5008 = vmatprep.subr.msk.bf16.mxu0 %vm338_vm0, %v5291_v23  ;;  %v595_v43 = vsel %vm5259_vm4, %v590_v37, %v594_v20  ;;  %v617_v44 = vor.u32 %v616_v38, %v613_v34  ;;  %v5033_v10 = vld [vmem:[%s5223_s19 + $0xc0] ss:$8 sps:$4 sm:$0xff]   ;;  %v636_v49 = vrot.slane %v634_v39, 5  ;;  %v998_v61 = vshll.u32 %v4146_v54, 16  ;;  %v4151_v4 = vld [vmem:[%s5223_s19 + $0xa4] sm:$0x1] }
  0x28   : > { %4722 = vmatprep.mubr.msk.bf16.mxu1 %vm325_vm1, %v5032_v11  ;;  %v609_v47 = vsel %vm5259_vm4, %v604_v40, %v608_v30  ;;  %v631_v48 = vor.u32 %v630_v42, %v627_v41  ;;  %v1004_v62 = vshll.u32 %v4147_v56, 16  ;;  %v4150_v63 = vld [vmem:[%s5223_s19 + $0xa0] sm:$0xf]  ;;  %v1009_v1 = vshrl.u32 %v4148_v57, 16  ;;  %v4152_v9 = vld [vmem:[%s5223_s19 + $0xa8] sm:$0xf] }
  0x29   : > { %v4106_v50 = vcombine.low %v595_v43, %v609_v47  ;;  %v618_v51 = vrot.slane %v617_v44, 4  ;;  %v1012_v2 = vshll.u32 %v4148_v57, 16  ;;  %v1018_v3 = vshll.u32 %v4149_v58, 16  ;;  %v4153_v16 = vld [vmem:[%s5223_s19 + $0xac] sm:$0x1] }
  0x2a   : > { %v632_v52 = vrot.slane %v631_v48, 4  ;;  %v997_v6 = vrot.slane %v995_v60, 4  ;;  %v1000_v7 = vrot.slane %v998_v61, 5  ;;  %v1006_v8 = vrot.slane %v1004_v62, 5  ;;  %v5035_v27 = vld [vmem:[%s5223_s19 + $0xe8] ss:$8 sps:$4 sm:$0xff]  }
  0x2b   : > { %4712 = vmatprep.mubr.msk.bf16.mxu0 %vm325_vm1, %v4106_v50  ;;  %v623_v55 = vsel %vm5259_vm4, %v618_v51, %v622_v45  ;;  %v1023_v12 = vshrl.u32 %v4150_v63, 16  ;;  %v1011_v13 = vrot.slane %v1009_v1, 4  ;;  %v1014_v14 = vrot.slane %v1012_v2, 5  ;;  %v5036_v35 = vld [vmem:[%s5223_s19 + $0xf8] ss:$8 sps:$4 sm:$0xff]  }
  0x2c   : > { %v637_v59 = vsel %vm5259_vm4, %v632_v52, %v636_v49  ;;  %v1020_v15 = vrot.slane %v1018_v3, 5  ;;  %v1026_v17 = vshll.u32 %v4150_v63, 16  ;;  %v1001_v18 = vor.u32 %v1000_v7, %v997_v6  ;;  %v4154_v38 = vld [vmem:[%s5223_s19 + $0xb0] sm:$0xf]  ;;  %v4155_v42 = vld [vmem:[%s5223_s19 + $0xb4] sm:$0x1] }
  0x2d   : > { %4723 = vmatmul.mubr.msk.bf16.gmra.mxu1 %vm325_vm1, %v5033_v10  ;;  %v4107_v0 = vcombine.low %v623_v55, %v637_v59  ;;  %v1025_v19 = vrot.slane %v1023_v12, 4  ;;  %v1032_v20 = vshll.u32 %v4151_v4, 16  ;;  %v1037_v21 = vshrl.u32 %v4152_v9, 16  ;;  %v4156_v43 = vld [vmem:[%s5223_s19 + $0xb8] sm:$0xf] }
  0x2e   : > { %v1015_v22 = vor.u32 %v1014_v14, %v1011_v13  ;;  %v1028_v24 = vrot.slane %v1026_v17, 5  ;;  %v1040_v25 = vshll.u32 %v4152_v9, 16  ;;  %v1046_v26 = vshll.u32 %v4153_v16, 16  ;;  %v4157_v10 = vld [vmem:[%s5223_s19 + $0xbc] sm:$0x1] }
  0x2f   : > { %4713 = vmatmul.mubr.msk.bf16.gmra.mxu0 %vm325_vm1, %v4107_v0  ;;  %v1252_v28 = vsel %vm338_vm0, %v5291_v23, 0  ;;  %v1002_v29 = vrot.slane %v1001_v18, 4  ;;  %v1034_v30 = vrot.slane %v1032_v20, 5  ;;  %v1039_v31 = vrot.slane %v1037_v21, 4  ;;  %v5337_v23 = vld [vmem:[%s6089_s1 + $0x10] sm:$0x3] }
  0x30   : > { %4728 = vmatprep.mubr.msk.bf16.mxu0 %vm325_vm1, %v5034_v53  ;;  %v1016_v32 = vrot.slane %v1015_v22, 4  ;;  %v1029_v33 = vor.u32 %v1028_v24, %v1025_v19  ;;  %v1042_v34 = vrot.slane %v1040_v25, 5  ;;  %v1048_v37 = vrot.slane %v1046_v26, 5  ;;  %v4158_v53 = vld [vmem:[%s5223_s19 + $0xc0] sm:$0xf] }
  0x31   : > { %v1007_v36 = vsel %vm5259_vm4, %v1002_v29, %v1006_v8  ;;  %v1371_v39 = vsel %vm338_vm0, %v5277_v5, 0  ;;  %v1051_v44 = vshrl.u32 %v4154_v38, 16  ;;  %v1054_v47 = vshll.u32 %v4154_v38, 16  ;;  %v4159_v58 = vld [vmem:[%s5223_s19 + $0xc4] sm:$0x1] }
  0x32   : > { %v1021_v11 = vsel %vm5259_vm4, %v1016_v32, %v1020_v15  ;;  %v1030_v40 = vrot.slane %v1029_v33, 4  ;;  %v1043_v41 = vor.u32 %v1042_v34, %v1039_v31  ;;  %v1060_v48 = vshll.u32 %v4155_v42, 16  ;;  %v5037_v60 = vld [vmem:[%s5223_s19 + $0x108] ss:$8 sps:$4 sm:$0xff]   ;;  %v4161_v63 = vld [vmem:[%s5223_s19 + $0xcc] sm:$0x1] }
  0x33   : > { %v4163_v45 = vcombine.low %v1007_v36, %v1021_v11  ;;  %v1065_v5 = vshrl.u32 %v4156_v43, 16  ;;  %v1053_v51 = vrot.slane %v1051_v44, 4  ;;  %v1068_v52 = vshll.u32 %v4156_v43, 16  ;;  %v4160_v62 = vld [vmem:[%s5223_s19 + $0xc8] sm:$0xf] }
  0x34   : > { %v1035_v49 = vsel %vm5259_vm4, %v1030_v40, %v1034_v30  ;;  %v1044_v50 = vrot.slane %v1043_v41, 4  ;;  %v1056_v54 = vrot.slane %v1054_v47, 5  ;;  %v1062_v55 = vrot.slane %v1060_v48, 5  ;;  %v5038_v12 = vld [vmem:[%s5223_s19 + $0x8] ss:$8 sps:$4 sm:$0xff]  }
  0x35   : > { %4738 = vmatprep.mubr.msk.bf16.mxu1 %vm325_vm1, %v4163_v45  ;;  %v1067_v56 = vrot.slane %v1065_v5, 4  ;;  %v1074_v57 = vshll.u32 %v4157_v10, 16  ;;  %v1070_v61 = vrot.slane %v1068_v52, 5  ;;  %v1079_v0 = vshrl.u32 %v4158_v53, 16  ;;  %v5039_v32 = vld [vmem:[%s5223_s19 + $0x18] ss:$8 sps:$4 sm:$0xff]  }
  0x36   : > { %v1049_v59 = vsel %vm5259_vm4, %v1044_v50, %v1048_v37  ;;  %v1057_v2 = vor.u32 %v1056_v54, %v1053_v51  ;;  %v1082_v4 = vshll.u32 %v4158_v53, 16  ;;  %v1088_v8 = vshll.u32 %v4159_v58, 16  ;;  %v5040_v34 = vld [vmem:[%s5223_s19 + $0x50] ss:$8 sps:$4 sm:$0xff]   ;;  %v4205_v37 = vld [vmem:[%s5223_s19 + $0x8] sm:$0xf] }
  0x37   : > { %4729 = vmatmul.mubr.msk.bf16.vlgmr.msra.gmra.mxu0 %vm325_vm1, %v5035_v27  ;;  %v4164_v1 = vcombine.low %v1035_v49, %v1049_v59  ;;  %v1076_v3 = vrot.slane %v1074_v57, 5  ;;  %v1071_v6 = vor.u32 %v1070_v61, %v1067_v56  ;;  %v1081_v7 = vrot.slane %v1079_v0, 4  ;;  %v5042_v36 = vld [vmem:[%s5223_s19 + $0x28] ss:$8 sps:$4 sm:$0xff]   ;;  %v4206_v38 = vld [vmem:[%s5223_s19 + $0xc] sm:$0x1] }
  0x38   : > { %4747 = vmatpush3.bf16.msra.mxu0 %v1252_v28  ;;  %4732 = vmatprep.mubr.msk.bf16.mxu0 %vm325_vm1, %v5036_v35  ;;  %v1093_v9 = vshrl.u32 %v4160_v62, 16  ;;  %v1058_v13 = vrot.slane %v1057_v2, 4  ;;  %v1084_v14 = vrot.slane %v1082_v4, 5  ;;  %v1096_v15 = vshll.u32 %v4160_v62, 16  ;;  %v4208_v11 = vld [vmem:[%s5223_s19 + $0x14] sm:$0x1] }
  0x39   : > { %5010 = vmatprep.subr.msk.bf16.mxu0 %vm338_vm0, %v5337_v23  ;;  %4739 = vmatmul.mubr.msk.bf16.vlgmr.msra.gmra.mxu1 %vm325_vm1, %v4164_v1  ;;  %v1102_v16 = vshll.u32 %v4161_v63, 16  ;;  %v1072_v17 = vrot.slane %v1071_v6, 4  ;;  %v1090_v21 = vrot.slane %v1088_v8, 5  ;;  %v1601_v31 = vsel %vm338_vm0, %v5337_v23, 0  ;;  %v4209_v45 = vld [vmem:[%s5223_s19 + $0x18] sm:$0xf] }
  0x3a   : > { %v1095_v18 = vrot.slane %v1093_v9, 4  ;;  %4757 = vmatpush3.bf16.msra.mxu1 %v1371_v39  ;;  %v1063_v19 = vsel %vm5259_vm4, %v1058_v13, %v1062_v55  ;;  %v1085_v20 = vor.u32 %v1084_v14, %v1081_v7  ;;  %v1098_v22 = vrot.slane %v1096_v15, 5  ;;  %v4207_v39 = vld [vmem:[%s5223_s19 + $0x10] sm:$0xf]  ;;  %v4210_v48 = vld [vmem:[%s5223_s19 + $0x1c] sm:$0x1] }
  0x3b   : > { %v1077_v24 = vsel %vm5259_vm4, %v1072_v17, %v1076_v3  ;;  %v1104_v28 = vrot.slane %v1102_v16, 5  ;;  %v1463_v40 = vshrl.u32 %v4205_v37, 16  ;;  %v1466_v41 = vshll.u32 %v4205_v37, 16  ;;  %v4211_v5 = vld [vmem:[%s5223_s19 + $0x20] sm:$0xf] }
  0x3c   : > { %v4165_v25 = vcombine.low %v1063_v19, %v1077_v24  ;;  %v1086_v26 = vrot.slane %v1085_v20, 4  ;;  %v1099_v27 = vor.u32 %v1098_v22, %v1095_v18  ;;  %v1472_v23 = vshll.u32 %v4206_v38, 16  ;;  %v5041_v49 = vld [vmem:[%s5223_s19 + $0x60] ss:$8 sps:$4 sm:$0xff]   ;;  %v4212_v55 = vld [vmem:[%s5223_s19 + $0x24] sm:$0x1] }
  0x3d   : > { %v1477_v42 = vshrl.u32 %v4207_v39, 16  ;;  %v1480_v43 = vshll.u32 %v4207_v39, 16  ;;  %v1486_v44 = vshll.u32 %v4208_v11, 16  ;;  %v1465_v10 = vrot.slane %v1463_v40, 4  ;;  %v5043_v50 = vld [vmem:[%s5223_s19 + $0x38] ss:$8 sps:$4 sm:$0xff]  }
  0x3e   : > { %4742 = vmatprep.mubr.msk.bf16.mxu1 %vm325_vm1, %v4165_v25  ;;  %v1091_v29 = vsel %vm5259_vm4, %v1086_v26, %v1090_v21  ;;  %v1100_v30 = vrot.slane %v1099_v27, 4  ;;  %v1468_v47 = vrot.slane %v1466_v41, 5  ;;  %v1474_v51 = vrot.slane %v1472_v23, 5  ;;  %v5044_v56 = vld [vmem:[%s5223_s19 + $0x70] ss:$8 sps:$4 sm:$0xff]  }
  0x3f   : > { %4733 = vmatmul.mubr.msk.bf16.gmra.mxu0 %vm325_vm1, %v5037_v60  ;;  %v1479_v52 = vrot.slane %v1477_v42, 4  ;;  %v1482_v53 = vrot.slane %v1480_v43, 5  ;;  %v1488_v54 = vrot.slane %v1486_v44, 5  ;;  %v1491_v58 = vshrl.u32 %v4209_v45, 16  ;;  %v4213_v61 = vld [vmem:[%s5223_s19 + $0x28] sm:$0xf] }
  0x40   : > { %4748 = vmatprep.mubr.msk.bf16.mxu0 %vm325_vm1, %v5038_v12  ;;  %v1105_v33 = vsel %vm5259_vm4, %v1100_v30, %v1104_v28  ;;  %v1469_v57 = vor.u32 %v1468_v47, %v1465_v10  ;;  %v1494_v59 = vshll.u32 %v4209_v45, 16  ;;  %v1500_v60 = vshll.u32 %v4210_v48, 16  ;;  %v4214_v2 = vld [vmem:[%s5223_s19 + $0x2c] sm:$0x1]  ;;  %v4215_v8 = vld [vmem:[%s5223_s19 + $0x30] sm:$0xf] }
  0x41   : > { %v4166_v35 = vcombine.low %v1091_v29, %v1105_v33  ;;  %v1483_v62 = vor.u32 %v1482_v53, %v1479_v52  ;;  %v1505_v63 = vshrl.u32 %v4211_v5, 16  ;;  %v1508_v0 = vshll.u32 %v4211_v5, 16  ;;  %v4216_v17 = vld [vmem:[%s5223_s19 + $0x34] sm:$0x1]  ;;  %v4217_v25 = vld [vmem:[%s5223_s19 + $0x38] sm:$0xf] }
  0x42   : > { %v1514_v1 = vshll.u32 %v4212_v55, 16  ;;  %v1470_v3 = vrot.slane %v1469_v57, 4  ;;  %v1493_v4 = vrot.slane %v1491_v58, 4  ;;  %v1496_v6 = vrot.slane %v1494_v59, 5  ;;  %v4218_v26 = vld [vmem:[%s5223_s19 + $0x3c] sm:$0x1] }
  0x43   : > { %4743 = vmatmul.mubr.msk.bf16.gmra.mxu1 %vm325_vm1, %v4166_v35  ;;  %v1502_v7 = vrot.slane %v1500_v60, 5  ;;  %v1484_v9 = vrot.slane %v1483_v62, 4  ;;  %v1507_v12 = vrot.slane %v1505_v63, 4  ;;  %v1510_v13 = vrot.slane %v1508_v0, 5 }
  0x44   : > { %4758 = vmatprep.mubr.msk.bf16.mxu1 %vm325_vm1, %v5040_v34  ;;  %v1516_v14 = vrot.slane %v1514_v1, 5  ;;  %v1475_v15 = vsel %vm5259_vm4, %v1470_v3, %v1474_v51  ;;  %v1497_v16 = vor.u32 %v1496_v6, %v1493_v4  ;;  %v1519_v18 = vshrl.u32 %v4213_v61, 16  ;;  %v5046_v3 = vld [vmem:[%s6091_s3 + $0x38] sm:$0xff]   ;;  %v5047_v4 = vld [vmem:[%s6091_s3 + $0x30] sm:$0xff]  }
  0x45   : > { %v1522_v19 = vshll.u32 %v4213_v61, 16  ;;  %v1489_v20 = vsel %vm5259_vm4, %v1484_v9, %v1488_v54  ;;  %v1511_v21 = vor.u32 %v1510_v13, %v1507_v12  ;;  %v1528_v22 = vshll.u32 %v4214_v2, 16  ;;  %v5050_v9 = vld [vmem:[%s6091_s3 + $0x20] sm:$0xff]   ;;  %v5051_v12 = vld [vmem:[%s6091_s3 + $0x70] sm:$0xff]   ;;  %v5052_v13 = vld [vmem:[%s6091_s3 + $0x18] sm:$0xff]  }
  0x46   : > { %v1533_v24 = vshrl.u32 %v4215_v8, 16  ;;  %v4222_v27 = vcombine.low %v1475_v15, %v1489_v20  ;;  %v1498_v28 = vrot.slane %v1497_v16, 4  ;;  %v1521_v29 = vrot.slane %v1519_v18, 4  ;;  %v5054_v15 = vld [vmem:[%s6091_s3 + $0x10] sm:$0xff]   ;;  %v5055_v16 = vld [vmem:[%s6091_s3 + $0x60] sm:$0xff]   ;;  %v5057_v18 = vld [vmem:[%s6091_s3 + $0x58] sm:$0xff]  }
  0x47   : > { %4749 = vmatmul.mubr.msk.bf16.vlgmr.msra.gmra.mxu0 %vm325_vm1, %v5039_v32  ;;  %v1524_v30 = vrot.slane %v1522_v19, 5  ;;  %v5045_v32 = vld [vmem:[%s5223_s19 + $0x80] ss:$8 sps:$4 sm:$0xff]   ;;  %v1512_v33 = vrot.slane %v1511_v21, 4  ;;  %v1536_v35 = vshll.u32 %v4215_v8, 16  ;;  %v1542_v39 = vshll.u32 %v4216_v17, 16 }
  0x48   : > { %4767 = vmatpush3.bf16.msra.mxu0 %v1601_v31  ;;  %4752 = vmatprep.mubr.msk.bf16.mxu0 %vm325_vm1, %v5042_v36  ;;  %v4219_v31 = vld [vmem:[%s5223_s19 + $0x40] sm:$0xf]  ;;  %v1535_v34 = vrot.slane %v1533_v24, 4  ;;  %v4220_v36 = vld [vmem:[%s5223_s19 + $0x44] sm:$0x1]  ;;  %v1503_v37 = vsel %vm5259_vm4, %v1498_v28, %v1502_v7  ;;  %v1547_v11 = vshrl.u32 %v4217_v25, 16 }
  0x49   : > { %v1525_v38 = vor.u32 %v1524_v30, %v1521_v29  ;;  %v1517_v40 = vsel %vm5259_vm4, %v1512_v33, %v1516_v14  ;;  %v1530_v41 = vrot.slane %v1528_v22, 5  ;;  %v1538_v23 = vrot.slane %v1536_v35, 5  ;;  %4800 = vmatprep.subr.bf16.mxu0 %v5046_v3  ;;  %v5048_v7 = vld [vmem:[%s6091_s3 + $0x28] sm:$0xff]   ;;  %v5049_v8 = vld [vmem:[%s6091_s3 + $0x78] sm:$0xff]   ;;  %v5058_v19 = vld [vmem:[%s6091_s3] sm:$0xff]  }
  0x4a   : > { %v1550_v42 = vshll.u32 %v4217_v25, 16  ;;  %v4223_v43 = vcombine.low %v1503_v37, %v1517_v40  ;;  %v1549_v45 = vrot.slane %v1547_v11, 4  ;;  %v1556_v10 = vshll.u32 %v4218_v26, 16  ;;  %4776 = vmatprep.subr.bf16.mxu1 %v5049_v8  ;;  %v5053_v14 = vld [vmem:[%s6091_s3 + $0x68] sm:$0xff]   ;;  %v5059_v20 = vld [vmem:[%s6091_s3 + $0x50] sm:$0xff]   ;;  %v5469_v21 = vld [vmem:[%s6091_s3 + $0xf8] sm:$0xff]  }
  0x4b   : > { %4759 = vmatmul.mubr.msk.bf16.vlgmr.msra.gmra.mxu1 %vm325_vm1, %v5041_v49  ;;  %v1526_v44 = vrot.slane %v1525_v38, 4  ;;  %v1539_v47 = vor.u32 %v1538_v23, %v1535_v34  ;;  %v1544_v48 = vrot.slane %v1542_v39, 5  ;;  %v1561_v49 = vshrl.u32 %v4219_v31, 16  ;;  %v5056_v17 = vld [vmem:[%s6091_s3 + $0x8] sm:$0xff]   ;;  %v5065_v24 = vld [vmem:[%s6091_s3 + $0x40] sm:$0xff]   ;;  %v5481_v25 = vld [vmem:[%s6091_s3 + $0xb8] sm:$0xff]  }
  0x4c   : > { %4762 = vmatprep.mubr.msk.bf16.mxu1 %vm325_vm1, %v5044_v56  ;;  %v1552_v5 = vrot.slane %v1550_v42, 5  ;;  %v1570_v51 = vshll.u32 %v4220_v36, 16  ;;  %v1558_v56 = vrot.slane %v1556_v10, 5  ;;  %v5142_v6 = vmov 0   ;;  %4777 = vmatpush3.bf16.msra.mxu1 %v5049_v8  ;;  %v5062_v22 = vld [vmem:[%s6091_s3 + $0x48] sm:$0xff]  }
  0x4d   : > { %v1531_v52 = vsel %vm5259_vm4, %v1526_v44, %v1530_v41  ;;  %v1540_v53 = vrot.slane %v1539_v47, 4  ;;  %v1563_v55 = vrot.slane %v1561_v49, 4  ;;  %1705 = vst [vmem:[#allocation2 + $0x18] sm:$0xf] %v5142_v6  ;;  %1706 = vst [vmem:[#allocation2 + $0x1c] sm:$0x1] %v5142_v6  ;;  %4778 = vmatprep.subr.bf16.mxu1 %v5051_v12 }
  0x4e   : > { %v1553_v54 = vor.u32 %v1552_v5, %v1549_v45  ;;  %v1572_v60 = vrot.slane %v1570_v51, 5  ;;  %1699 = vst [vmem:[#allocation2] sm:$0xf] %v5142_v6  ;;  %1700 = vst [vmem:[#allocation2 + $0x4] sm:$0x1] %v5142_v6 }
  0x4f   : > { %4753 = vmatmul.mubr.msk.bf16.gmra.mxu0 %vm325_vm1, %v5043_v50  ;;  %v1564_v50 = vshll.u32 %v4219_v31, 16  ;;  %v1545_v58 = vsel %vm5259_vm4, %v1540_v53, %v1544_v48  ;;  %1701 = vst [vmem:[#allocation2 + $0x8] sm:$0xf] %v5142_v6  ;;  %1702 = vst [vmem:[#allocation2 + $0xc] sm:$0x1] %v5142_v6 }
  0x50   : > { %4768 = vmatprep.mubr.msk.bf16.mxu0 %vm325_vm1, %v4222_v27  ;;  %v1554_v59 = vrot.slane %v1553_v54, 4  ;;  %v4224_v61 = vcombine.low %v1531_v52, %v1545_v58  ;;  %1703 = vst [vmem:[#allocation2 + $0x10] sm:$0xf] %v5142_v6  ;;  %1704 = vst [vmem:[#allocation2 + $0x14] sm:$0x1] %v5142_v6  ;;  %4779 = vmatpush3.bf16.msra.mxu1 %v5051_v12 }
  0x51   : > { %v1566_v57 = vrot.slane %v1564_v50, 5  ;;  %1707 = vst [vmem:[#allocation2 + $0x20] sm:$0xf] %v5142_v6  ;;  %1708 = vst [vmem:[#allocation2 + $0x24] sm:$0x1] %v5142_v6  ;;  %4780 = vmatprep.subr.bf16.mxu1 %v5053_v14 }
  0x52   : > { %v1559_v63 = vsel %vm5259_vm4, %v1554_v59, %v1558_v56  ;;  %1709 = vst [vmem:[#allocation2 + $0x28] sm:$0xf] %v5142_v6  ;;  %1710 = vst [vmem:[#allocation2 + $0x2c] sm:$0x1] %v5142_v6 }
  0x53   : > { %4763 = vmatmul.mubr.msk.bf16.gmra.mxu1 %vm325_vm1, %v5045_v32  ;;  %v1567_v62 = vor.u32 %v1566_v57, %v1563_v55  ;;  %1711 = vst [vmem:[#allocation2 + $0x30] sm:$0xf] %v5142_v6  ;;  %1712 = vst [vmem:[#allocation2 + $0x34] sm:$0x1] %v5142_v6 }
  0x54   : > { %1713 = vst [vmem:[#allocation2 + $0x38] sm:$0xf] %v5142_v6  ;;  %1714 = vst [vmem:[#allocation2 + $0x3c] sm:$0x1] %v5142_v6  ;;  %4781 = vmatpush3.bf16.msra.mxu1 %v5053_v14 }
  0x55   : > { %v1568_v0 = vrot.slane %v1567_v62, 4  ;;  %1715 = vst [vmem:[#allocation2 + $0x40] sm:$0xf] %v5142_v6  ;;  %1716 = vst [vmem:[#allocation2 + $0x44] sm:$0x1] %v5142_v6  ;;  %4782 = vmatprep.subr.bf16.mxu1 %v5055_v16 }
  0x56   : > { %1717 = vst [vmem:[#allocation2 + $0x48] sm:$0xf] %v5142_v6  ;;  %1718 = vst [vmem:[#allocation2 + $0x4c] sm:$0x1] %v5142_v6 }
  0x57   : > { %4769 = vmatmul.mubr.msk.bf16.vlgmr.msra.gmra.mxu0 %vm325_vm1, %v4223_v43  ;;  %v1573_v1 = vsel %vm5259_vm4, %v1568_v0, %v1572_v60 }
  0x58   : > { %4772 = vmatprep.mubr.msk.bf16.mxu0 %vm325_vm1, %v4224_v61  ;;  %v4225_v2 = vcombine.low %v1559_v63, %v1573_v1  ;;  %4801 = vmatpush3.bf16.msra.mxu0 %v5046_v3 }
  0x59   : > { %4802 = vmatprep.subr.bf16.mxu0 %v5047_v4  ;;  %4783 = vmatpush3.bf16.msra.mxu1 %v5055_v16 }
  0x5a   : > { %4784 = vmatprep.subr.bf16.mxu1 %v5057_v18 }
  0x5c   : > { %4803 = vmatpush3.bf16.msra.mxu0 %v5047_v4 }
  0x5d   : > { %4804 = vmatprep.subr.bf16.mxu0 %v5048_v7  ;;  %4785 = vmatpush3.bf16.msra.mxu1 %v5057_v18 }
  0x5e   : > { %4786 = vmatprep.subr.bf16.mxu1 %v5059_v20 }
  0x5f   : > { %4773 = vmatmul.mubr.msk.bf16.gmra.mxu0 %vm325_vm1, %v4225_v2 }
  0x60   : > { %4805 = vmatpush3.bf16.msra.mxu0 %v5048_v7 }
  0x61   : > { %4806 = vmatprep.subr.bf16.mxu0 %v5050_v9  ;;  %4787 = vmatpush3.bf16.msra.mxu1 %v5059_v20 }
  0x62   : > { %4788 = vmatprep.subr.bf16.mxu1 %v5062_v22 }
  0x64   : > { %4807 = vmatpush3.bf16.msra.mxu0 %v5050_v9 }
  0x65   : > { %4808 = vmatprep.subr.bf16.mxu0 %v5052_v13  ;;  %4789 = vmatpush3.bf16.msra.mxu1 %v5062_v22 }
  0x66   : > { %4790 = vmatprep.subr.bf16.mxu1 %v5065_v24 }
  0x68   : > { %4809 = vmatpush3.bf16.msra.mxu0 %v5052_v13 }
  0x69   : > { %4810 = vmatprep.subr.bf16.mxu0 %v5054_v15  ;;  %4791 = vmatpush3.bf16.msra.mxu1 %v5065_v24 }
  0x6a   : > { %4824 = vmatprep.subr.bf16.mxu1 %v5481_v25 }
  0x6c   : > { %4811 = vmatpush3.bf16.msra.mxu0 %v5054_v15 }
  0x6d   : > { %4812 = vmatprep.subr.bf16.mxu0 %v5056_v17 }
  0x70   : > { %4813 = vmatpush3.bf16.msra.mxu0 %v5056_v17 }
  0x71   : > { %4814 = vmatprep.subr.bf16.mxu0 %v5058_v19 }
  0x74   : > { %4815 = vmatpush3.bf16.msra.mxu0 %v5058_v19 }
  0x75   : > { %4848 = vmatprep.subr.bf16.mxu0 %v5469_v21 }
  0xd4   : > { %v4690_v26 = vpop.f32.mrf.mxu0 }
  0xd5   : > { %v4700_v27 = vpop.f32.mrf.mxu1 }
  0xd6   : > { %v376_v28 = vpop.f32.mrf.mxu0  ;;  %v485_v2 = vadd.f32 %v4700_v27, %v4690_v26 }
  0xd7   : > { %v476_v29 = vpop.f32.mrf.mxu1 }
  0xd8   : > { %v4691_v30 = vpop.f32.mrf.mxu0  ;;  %v477_v4 = vadd.f32 %v476_v29, %v376_v28  ;;  %v5502_v28 = vld [vmem:[#allocation2] sm:$0xf] }
  0xd9   : > { %v4701_v31 = vpop.f32.mrf.mxu1 }
  0xda   : > { %v379_v32 = vpop.f32.mrf.mxu0  ;;  %v488_v9 = vadd.f32 %v4701_v31, %v4691_v30 }
  0xdb   : > { %v479_v33 = vpop.f32.mrf.mxu1 }
  0xdc   : > { %v4694_v34 = vpop.f32.mrf.mxu0  ;;  %v480_v17 = vadd.f32 %v479_v33, %v379_v32 }
  0xdd   : > { %v4704_v35 = vpop.f32.mrf.mxu1 }
  0xde   : > { %v392_v36 = vpop.f32.mrf.mxu0  ;;  %v501_v31 = vadd.f32 %v4704_v35, %v4694_v34  ;;  %v1922_v34 = vshll.u32 %v5502_v28, 16 }
  0xdf   : > { %v492_v37 = vpop.f32.mrf.mxu1 }
  0xe0   : > { %v4695_v38 = vpop.f32.mrf.mxu0 }
  0xe1   : > { %v4705_v39 = vpop.f32.mrf.mxu1 }
  0xe2   : > { %v395_v40 = vpop.f32.mrf.mxu0 }
  0xe3   : > { %v495_v11 = vpop.f32.mrf.mxu1 }
  0xe5   : > { %v4720_v41 = vpop.f32.mrf.mxu1  ;;  %v4710_v42 = vpop.f32.mrf.mxu0 }
  0xe6   : > { %v734_v6 = vadd.f32 %v4710_v42, %v485_v2  ;;  %v493_v42 = vadd.f32 %v492_v37, %v392_v36 }
  0xe7   : > { %v820_v23 = vpop.f32.mrf.mxu1  ;;  %v701_v44 = vpop.f32.mrf.mxu0 }
  0xe8   : > { %v732_v12 = vadd.f32 %v701_v44, %v477_v4  ;;  %v853_v15 = vadd.f32 %v4720_v41, %v734_v6  ;;  %v504_v44 = vadd.f32 %v4705_v39, %v4695_v38  ;;  %v1919_v4 = vshrl.u32 %v5502_v28, 16 }
  0xe9   : > { %v4721_v43 = vpop.f32.mrf.mxu1  ;;  %v4711_v45 = vpop.f32.mrf.mxu0 }
  0xea   : > { %v735_v16 = vadd.f32 %v4711_v45, %v488_v9  ;;  %v851_v20 = vadd.f32 %v820_v23, %v732_v12  ;;  %v496_v45 = vadd.f32 %v495_v11, %v395_v40 }
  0xeb   : > { %v823_v10 = vpop.f32.mrf.mxu1  ;;  %v704_v47 = vpop.f32.mrf.mxu0 }
  0xec   : > { %v733_v24 = vadd.f32 %v704_v47, %v480_v17  ;;  %v854_v29 = vadd.f32 %v4721_v43, %v735_v16 }
  0xed   : > { %v5484_v48 = vpop.f32.mrf.mxu1 }
  0xef   : > { %v4714_v5 = vpop.f32.mrf.mxu0  ;;  %v5486_v49 = vpop.f32.mrf.mxu1 }
  0xf0   : > { %v738_v23 = vadd.f32 %v4714_v5, %v501_v31 }
  0xf1   : > { %v717_v50 = vpop.f32.mrf.mxu0  ;;  %v5488_v52 = vpop.f32.mrf.mxu1 }
  0xf2   : > { %v736_v47 = vadd.f32 %v717_v50, %v493_v42  ;;  %v857_v11 = vadd.f32 %v5484_v48, %v738_v23  ;;  %v5513_v48 = vld [vmem:[%s6090_s2] ss:$0 sm:$0xff] }
  0xf3   : > { %v4715_v51 = vpop.f32.mrf.mxu0  ;;  %v5490_v55 = vpop.f32.mrf.mxu1 }
  0xf4   : > { %v739_v6 = vadd.f32 %v4715_v51, %v504_v44  ;;  %v855_v40 = vadd.f32 %v5486_v49, %v736_v47  ;;  %v1921_v51 = vrot.slane %v1919_v4, 4 }
  0xf5   : > { %v720_v53 = vpop.f32.mrf.mxu0 }
  0xf7   : > { %v4730_v54 = vpop.f32.mrf.mxu0 }
  0xf8   : > { %v972_v22 = vadd.f32 %v4730_v54, %v853_v15  ;;  %v852_v54 = vadd.f32 %v823_v10, %v733_v24  ;;  %v737_v15 = vadd.f32 %v720_v53, %v496_v45  ;;  %v858_v10 = vadd.f32 %v5488_v52, %v739_v6 }
  0xf9   : > { %v939_v56 = vpop.f32.mrf.mxu0  ;;  %v4740_v58 = vpop.f32.mrf.mxu1 }
  0xfa   : > { %v970_v30 = vadd.f32 %v939_v56, %v851_v20  ;;  %v1202_v32 = vadd.f32 %v4740_v58, %v972_v22  ;;  %v856_v53 = vadd.f32 %v5490_v55, %v737_v15  ;;  %v1924_v58 = vrot.slane %v1922_v34, 5 }
  0xfb   : > { %v4731_v57 = vpop.f32.mrf.mxu0  ;;  %v1169_v60 = vpop.f32.mrf.mxu1 }
  0xfc   : > { %v973_v33 = vadd.f32 %v4731_v57, %v854_v29  ;;  %v1200_v17 = vadd.f32 %v1169_v60, %v970_v30  ;;  %v1925_v24 = vor.u32 %v1924_v58, %v1921_v51 }
  0xfd   : > { %v942_v59 = vpop.f32.mrf.mxu0  ;;  %v4741_v62 = vpop.f32.mrf.mxu1 }
  0xfe   : > { %v971_v35 = vadd.f32 %v942_v59, %v852_v54  ;;  %v1203_v38 = vadd.f32 %v4741_v62, %v973_v33  ;;  %v5526_v15 = vrot.slane %v1925_v24, 4 }
  0xff   : > { %v4734_v61 = vpop.f32.mrf.mxu0  ;;  %v1172_v0 = vpop.f32.mrf.mxu1 }
 0x100   : > { %v976_v60 = vadd.f32 %v4734_v61, %v857_v11  ;;  %v1201_v59 = vadd.f32 %v1172_v0, %v971_v35 }
 0x101   : > { %v955_v63 = vpop.f32.mrf.mxu0 }
 0x103   : > { %v4735_v1 = vpop.f32.mrf.mxu0  ;;  %v5494_v7 = vpop.f32.mrf.mxu1 }
 0x104   : > { %v977_v16 = vadd.f32 %v4735_v1, %v858_v10  ;;  %v5517_v1 = vld [vmem:[#allocation2 + $0x4] sm:$0x1]  ;;  %v1206_v29 = vadd.f32 %v5494_v7, %v976_v60 }
 0x105   : > { %v5492_v3 = vpop.f32.mrf.mxu0  ;;  %v5496_v13 = vpop.f32.mrf.mxu1 }
 0x106   : > { %v975_v49 = vadd.f32 %v5492_v3, %v856_v53  ;;  %v1850_v53 = vld [vmem:[#allocation2 + $0x18] sm:$0xf] }
 0x107   : > { %v4750_v8 = vpop.f32.mrf.mxu0  ;;  %v5498_v18 = vpop.f32.mrf.mxu1 }
 0x108   : > { %v1321_v43 = vadd.f32 %v4750_v8, %v1202_v32  ;;  %v974_v8 = vadd.f32 %v955_v63, %v855_v40  ;;  %v1207_v3 = vadd.f32 %v5498_v18, %v977_v16  ;;  %v5067_v40 = vld [vmem:[%s6091_s3 + $0xe8] sm:$0xff]  }
 0x109   : > { %v1288_v14 = vpop.f32.mrf.mxu0  ;;  %v5500_v26 = vpop.f32.mrf.mxu1 }
 0x10a   : > { %v1319_v39 = vadd.f32 %v1288_v14, %v1200_v17  ;;  %v1204_v30 = vadd.f32 %v5496_v13, %v974_v8  ;;  %v1205_v42 = vadd.f32 %v5500_v26, %v975_v49  ;;  %v1835_v49 = vld [vmem:[#allocation2 + $0x8] sm:$0xf] }
 0x10b   : > { %v4751_v19 = vpop.f32.mrf.mxu0  ;;  %v4760_v2 = vpop.f32.mrf.mxu1 }
 0x10c   : > { %v1440_v56 = vadd.f32 %v4760_v2, %v1321_v43  ;;  %v1322_v57 = vadd.f32 %v4751_v19, %v1203_v38 }
 0x10d   : > { %v1291_v27 = vpop.f32.mrf.mxu0  ;;  %v1407_v9 = vpop.f32.mrf.mxu1 }
 0x10e   : > { %v1438_v52 = vadd.f32 %v1407_v9, %v1319_v39  ;;  %v1320_v22 = vadd.f32 %v1291_v27, %v1201_v59  ;;  %v1928_v27 = vshll.u32 %v5517_v1, 16 }
 0x10f   : > { %v4754_v41 = vpop.f32.mrf.mxu0  ;;  %v4761_v36 = vpop.f32.mrf.mxu1 }
 0x110   : > { %v1441_v61 = vadd.f32 %v4761_v36, %v1322_v57  ;;  %v1325_v33 = vadd.f32 %v4754_v41, %v1206_v29  ;;  %v5528_v35 = vrot.slane %v1928_v27, 5 }
 0x111   : > { %v1304_v12 = vpop.f32.mrf.mxu0  ;;  %v1410_v5 = vpop.f32.mrf.mxu1 }
 0x112   : > { %v1439_v4 = vadd.f32 %v1410_v5, %v1320_v22  ;;  %v1323_v23 = vadd.f32 %v1304_v12, %v1204_v30 }
 0x113   : > { %v4755_v37 = vpop.f32.mrf.mxu0  ;;  %v4764_v62 = vpop.f32.mrf.mxu1 }
 0x114   : > { %v1326_v54 = vadd.f32 %v4755_v37, %v1207_v3  ;;  %v1444_v41 = vadd.f32 %v4764_v62, %v1325_v33 }
 0x115   : > { %v1307_v50 = vpop.f32.mrf.mxu0  ;;  %v1423_v55 = vpop.f32.mrf.mxu1 }
 0x116   : > { %v1324_v6 = vadd.f32 %v1307_v50, %v1205_v42  ;;  %v1442_v12 = vadd.f32 %v1423_v55, %v1323_v23 }
 0x117   : > { %v4770_v14 = vpop.f32.mrf.mxu0  ;;  %v4765_v44 = vpop.f32.mrf.mxu1 }
 0x118   : > { %v1670_v20 = vadd.f32 %v4770_v14, %v1440_v56  ;;  %v1445_v36 = vadd.f32 %v4765_v44, %v1326_v54  ;;  %v1853_v56 = vld [vmem:[#allocation2 + $0x1c] sm:$0x1] }
 0x119   : > { %v1637_v19 = vpop.f32.mrf.mxu0  ;;  %v1426_v26 = vpop.f32.mrf.mxu1 }
 0x11a   : > { %v1685_v63 = vadd.f32 %v5513_v48, %v1670_v20  ;;  %v1668_v0 = vadd.f32 %v1637_v19, %v1438_v52  ;;  %v1443_v50 = vadd.f32 %v1426_v26, %v1324_v6  ;;  %v1841_v52 = vld [vmem:[#allocation2 + $0xc] sm:$0x1] }
 0x11b   : > { %v4771_v31 = vpop.f32.mrf.mxu0 }
 0x11c   : > { %v1693_v2 = vmax.f32 %v1685_v63, 0.0  ;;  %v1683_v45 = vadd.f32 %v5513_v48, %v1668_v0  ;;  %v1671_v32 = vadd.f32 %v4771_v31, %v1441_v61 }
 0x11d   : > { %v1640_v47 = vpop.f32.mrf.mxu0 }
 0x11e   : > { %v4522_v7 = vpack.c.bf16 %v1693_v2, %v1693_v2  ;;  %v1691_v13 = vmax.f32 %v1683_v45, 0.0  ;;  %v1686_v18 = vadd.f32 %v5513_v48, %v1671_v32  ;;  %v1669_v9 = vadd.f32 %v1640_v47, %v1439_v4  ;;  %v1856_v45 = vld [vmem:[#allocation2 + $0x20] sm:$0xf]  ;;  %v1859_v32 = vld [vmem:[#allocation2 + $0x24] sm:$0x1] }
 0x11f   : > { %v4774_v38 = vpop.f32.mrf.mxu0 }
 0x120   : > { %v1768_v17 = vshrl.u32 %v4522_v7, 16  ;;  %v4520_v43 = vpack.c.bf16 %v1691_v13, %v1691_v13  ;;  %v1694_v34 = vmax.f32 %v1686_v18, 0.0  ;;  %v1684_v37 = vadd.f32 %v5513_v48, %v1669_v9  ;;  %v1847_v18 = vld [vmem:[#allocation2 + $0x14] sm:$0x1] }
 0x121   : > { %v1771_v11 = vshll.u32 %v4522_v7, 16  ;;  %v1674_v60 = vadd.f32 %v4774_v38, %v1444_v41  ;;  %v1653_v59 = vpop.f32.mrf.mxu0  ;;  %v1844_v7 = vld [vmem:[#allocation2 + $0x10] sm:$0xf] }
 0x122   : > { %v1770_v39 = vrot.slane %v1768_v17, 7  ;;  %v1752_v10 = vshrl.u32 %v4520_v43, 16  ;;  %v4523_v5 = vpack.c.bf16 %v1694_v34, %v1694_v34  ;;  %v1755_v57 = vshll.u32 %v4520_v43, 16  ;;  %v5554_v17 = vld [vmem:[#allocation2] sm:$0xe] }
 0x123   : > { %v1692_v58 = vmax.f32 %v1684_v37, 0.0  ;;  %v1689_v55 = vadd.f32 %v5513_v48, %v1674_v60  ;;  %v1672_v19 = vadd.f32 %v1653_v59, %v1442_v12  ;;  %v4775_v61 = vpop.f32.mrf.mxu0 }
 0x124   : > { %v1773_v8 = vor.u32 %v1771_v11, %v1770_v39  ;;  %v1774_v16 = vrot.slane %v1770_v39, 4  ;;  %v1754_v62 = vrot.slane %v1752_v10, 7  ;;  %v1776_v14 = vshrl.u32 %v4523_v5, 16 }
 0x125   : > { %v1779_v20 = vshll.u32 %v4523_v5, 16  ;;  %v4521_v22 = vpack.c.bf16 %v1692_v58, %v1692_v58  ;;  %v1697_v27 = vmax.f32 %v1689_v55, 0.0  ;;  %v1656_v42 = vpop.f32.mrf.mxu0  ;;  %v1687_v33 = vadd.f32 %v5513_v48, %v1672_v19  ;;  %v1874_v5 = vld [vmem:[#allocation2 + $0x38] sm:$0xf] }
 0x126   : > { %v1851_v63 = vsel %vm5533_vm9, %v1773_v8, %v1850_v53  ;;  %v1854_v0 = vsel %vm5539_vm10, %v1774_v16, %v1853_v56  ;;  %v1757_v24 = vor.u32 %v1755_v57, %v1754_v62  ;;  %v1758_v29 = vrot.slane %v1754_v62, 4  ;;  %v1862_v62 = vld [vmem:[#allocation2 + $0x28] sm:$0xf] }
 0x127   : > { %1852 = vst [vmem:[#allocation2 + $0x18] sm:$0xf] %v1851_v63  ;;  %1855 = vst [vmem:[#allocation2 + $0x1c] sm:$0x1] %v1854_v0  ;;  %v1778_v30 = vrot.slane %v1776_v14, 7  ;;  %v1760_v3 = vshrl.u32 %v4521_v22, 16  ;;  %v1675_v4 = vadd.f32 %v4775_v61, %v1445_v36  ;;  %v4526_v13 = vpack.c.bf16 %v1697_v27, %v1697_v27 }
 0x128   : > { %v1763_v31 = vshll.u32 %v4521_v22, 16  ;;  %v1836_v44 = vsel %vm5533_vm9, %v1757_v24, %v1835_v49  ;;  %v1842_v2 = vsel %vm5539_vm10, %v1758_v29, %v1841_v52  ;;  %v1695_v6 = vmax.f32 %v1687_v33, 0.0 }
 0x129   : > { %1837 = vst [vmem:[#allocation2 + $0x8] sm:$0xf] %v1836_v44  ;;  %1843 = vst [vmem:[#allocation2 + $0xc] sm:$0x1] %v1842_v2  ;;  %v1781_v23 = vor.u32 %v1779_v20, %v1778_v30  ;;  %v1782_v54 = vrot.slane %v1778_v30, 4  ;;  %v1762_v47 = vrot.slane %v1760_v3, 7  ;;  %v1690_v9 = vadd.f32 %v5513_v48, %v1675_v4 }
 0x12a   : > { %v1673_v26 = vadd.f32 %v1656_v42, %v1443_v50  ;;  %v1800_v36 = vshrl.u32 %v4526_v13, 16  ;;  %v4524_v37 = vpack.c.bf16 %v1695_v6, %v1695_v6  ;;  %v1931_v39 = vsel %vm5259_vm4, %v5526_v15, %v5528_v35  ;;  %v1877_v50 = vld [vmem:[#allocation2 + $0x3c] sm:$0x1]  ;;  %v1880_v42 = vld [vmem:[#allocation2 + $0x40] sm:$0xf]  ;;  %v5072_v15 = vld [vmem:[%s6091_s3 + $0xb0] sm:$0xff]  }
 0x12b   : > { %v1857_v43 = vsel %vm5533_vm9, %v1781_v23, %v1856_v45  ;;  %v1860_v34 = vsel %vm5539_vm10, %v1782_v54, %v1859_v32  ;;  %v1765_v41 = vor.u32 %v1763_v31, %v1762_v47  ;;  %v1766_v12 = vrot.slane %v1762_v47, 4  ;;  %v1883_v2 = vld [vmem:[#allocation2 + $0x44] sm:$0x1]  ;;  %v1868_v54 = vld [vmem:[#allocation2 + $0x30] sm:$0xf] }
 0x12c   : > { %1858 = vst [vmem:[#allocation2 + $0x20] sm:$0xf] %v1857_v43  ;;  %1861 = vst [vmem:[#allocation2 + $0x24] sm:$0x1] %v1860_v34  ;;  %v1698_v38 = vmax.f32 %v1690_v9, 0.0  ;;  %v1688_v53 = vadd.f32 %v5513_v48, %v1673_v26  ;;  %v4279_v56 = vrot.slane %v5554_v17, 9 }
 0x12d   : > { %v1845_v11 = vsel %vm5533_vm9, %v1765_v41, %v1844_v7  ;;  %v1848_v10 = vsel %vm5539_vm10, %v1766_v12, %v1847_v18  ;;  %v1802_v57 = vrot.slane %v1800_v36, 7  ;;  %v1803_v58 = vshll.u32 %v4526_v13, 16  ;;  %v1865_v48 = vld [vmem:[#allocation2 + $0x2c] sm:$0x1]  ;;  %v1871_v47 = vld [vmem:[#allocation2 + $0x34] sm:$0x1] }
 0x12e   : > { %1846 = vst [vmem:[#allocation2 + $0x10] sm:$0xf] %v1845_v11  ;;  %1849 = vst [vmem:[#allocation2 + $0x14] sm:$0x1] %v1848_v10  ;;  %v1784_v60 = vshrl.u32 %v4524_v37, 16  ;;  %v4527_v59 = vpack.c.bf16 %v1698_v38, %v1698_v38  ;;  %v1787_v16 = vshll.u32 %v4524_v37, 16 }
 0x12f   : > { %v1889_v8 = vld [vmem:[#allocation2 + $0x18] sm:$0xf]  ;;  %v1696_v14 = vmax.f32 %v1688_v53, 0.0  ;;  %v1805_v20 = vor.u32 %v1803_v58, %v1802_v57  ;;  %v1806_v22 = vrot.slane %v1802_v57, 4  ;;  %v5064_v38 = vld [vmem:[%s6091_s3 + $0xf0] sm:$0xff]   ;;  %v5076_v17 = vld [vmem:[%s6091_s3 + $0xa0] sm:$0xff]  }
 0x130   : > { %v1961_v49 = vshrl.u32 %v1889_v8, 16  ;;  %v1964_v52 = vshll.u32 %v1889_v8, 16  ;;  %v1786_v55 = vrot.slane %v1784_v60, 7  ;;  %v1808_v19 = vshrl.u32 %v4527_v59, 16  ;;  %v1887_v61 = vld [vmem:[#allocation2 + $0x8] sm:$0xf] }
 0x131   : > { %v1811_v63 = vshll.u32 %v4527_v59, 16  ;;  %v4525_v0 = vpack.c.bf16 %v1696_v14, %v1696_v14  ;;  %v1933_v24 = vshrl.u32 %v1887_v61, 16  ;;  %v1936_v29 = vshll.u32 %v1887_v61, 16  ;;  %v5584_v11 = vld [vmem:[#allocation2 + $0xc] sm:$0x1] }
 0x132   : > { %v1875_v30 = vsel %vm5533_vm9, %v1805_v20, %v1874_v5  ;;  %v1878_v3 = vsel %vm5539_vm10, %v1806_v22, %v1877_v50  ;;  %v1789_v31 = vor.u32 %v1787_v16, %v1786_v55  ;;  %v1790_v27 = vrot.slane %v1786_v55, 4 }
 0x133   : > { %1876 = vst [vmem:[#allocation2 + $0x38] sm:$0xf] %v1875_v30  ;;  %1879 = vst [vmem:[#allocation2 + $0x3c] sm:$0x1] %v1878_v3  ;;  %v1810_v44 = vrot.slane %v1808_v19, 7  ;;  %v1792_v45 = vshrl.u32 %v4525_v0, 16  ;;  %v4267_v13 = vcombine.low %v5502_v28, %v1887_v61 }
 0x134   : > { %v1795_v32 = vshll.u32 %v4525_v0, 16  ;;  %v1935_v33 = vrot.slane %v1933_v24, 4  ;;  %v1863_v4 = vsel %vm5533_vm9, %v1789_v31, %v1862_v62  ;;  %v1866_v23 = vsel %vm5539_vm10, %v1790_v27, %v1865_v48  ;;  %v5579_v18 = vld [vmem:[#allocation2 + $0x20] sm:$0xf] }
 0x135   : > { %v1938_v7 = vrot.slane %v1936_v29, 5  ;;  %1864 = vst [vmem:[#allocation2 + $0x28] sm:$0xf] %v1863_v4  ;;  %1867 = vst [vmem:[#allocation2 + $0x2c] sm:$0x1] %v1866_v23  ;;  %v1813_v6 = vor.u32 %v1811_v63, %v1810_v44  ;;  %v1814_v9 = vrot.slane %v1810_v44, 4  ;;  %4816 = vmatprep.mubr.bf16.mxu0 %v4267_v13 }
 0x136   : > { %v1794_v26 = vrot.slane %v1792_v45, 7  ;;  %v1888_v43 = vld [vmem:[#allocation2 + $0x10] sm:$0xf]  ;;  %v1963_v34 = vrot.slane %v1961_v49, 4  ;;  %v1966_v36 = vrot.slane %v1964_v52, 5  ;;  %v1975_v60 = vshrl.u32 %v5579_v18, 16 }
 0x137   : > { %v1947_v41 = vshrl.u32 %v1888_v43, 16  ;;  %v1950_v12 = vshll.u32 %v1888_v43, 16  ;;  %v4268_v37 = vcombine.low %v1888_v43, %v1889_v8  ;;  %v1881_v28 = vsel %vm5533_vm9, %v1813_v6, %v1880_v42  ;;  %v5590_v53 = vld [vmem:[#allocation2 + $0x14] sm:$0x1]  ;;  %v5600_v49 = vld [vmem:[#allocation2 + $0x1c] sm:$0x1] }
 0x138   : > { %v1884_v10 = vsel %vm5539_vm10, %v1814_v9, %v1883_v2  ;;  %v1797_v5 = vor.u32 %v1795_v32, %v1794_v26  ;;  %v1798_v50 = vrot.slane %v1794_v26, 4  ;;  %1882 = vst [vmem:[#allocation2 + $0x40] sm:$0xf] %v1881_v28  ;;  %v1978_v59 = vshll.u32 %v5579_v18, 16  ;;  %v5606_v63 = vld [vmem:[#allocation2 + $0x24] sm:$0x1] }
 0x139   : > { %1885 = vst [vmem:[#allocation2 + $0x44] sm:$0x1] %v1884_v10  ;;  %v1949_v57 = vrot.slane %v1947_v41, 4  ;;  %v1952_v58 = vrot.slane %v1950_v12, 5  ;;  %4817 = vmatmul.mubr.bf16.vlgmr.msra.gmra.mxu0 %v4268_v37  ;;  %v1939_v62 = vor.u32 %v1938_v7, %v1935_v33  ;;  %v1942_v14 = vshll.u32 %v5584_v11, 16  ;;  %v5071_v23 = vld [vmem:[%s6091_s3 + $0xe0] sm:$0xff]  }
 0x13a   : > { %v1869_v8 = vsel %vm5533_vm9, %v1797_v5, %v1868_v54  ;;  %v1872_v16 = vsel %vm5539_vm10, %v1798_v50, %v1871_v47  ;;  %4849 = vmatpush3.bf16.msra.mxu0 %v5469_v21  ;;  %v1977_v52 = vrot.slane %v1975_v60, 4  ;;  %v1980_v20 = vrot.slane %v1978_v59, 5  ;;  %v1893_v22 = vld [vmem:[#allocation2 + $0x38] sm:$0xf]  ;;  %v5637_v12 = vld [vmem:[#allocation2 + $0x3c] sm:$0x1] }
 0x13b   : > { %1870 = vst [vmem:[#allocation2 + $0x30] sm:$0xf] %v1869_v8  ;;  %1873 = vst [vmem:[#allocation2 + $0x34] sm:$0x1] %v1872_v16  ;;  %4850 = vmatprep.subr.bf16.mxu0 %v5064_v38  ;;  %v1953_v55 = vor.u32 %v1952_v58, %v1949_v57  ;;  %v1956_v51 = vshll.u32 %v5590_v53, 16  ;;  %v1940_v19 = vrot.slane %v1939_v62, 4  ;;  %v1967_v30 = vor.u32 %v1966_v36, %v1963_v34 }
 0x13c   : > { %v1944_v21 = vrot.slane %v1942_v14, 5  ;;  %v2017_v61 = vshrl.u32 %v1893_v22, 16  ;;  %v2020_v48 = vshll.u32 %v1893_v22, 16  ;;  %v1891_v0 = vld [vmem:[#allocation2 + $0x28] sm:$0xf]  ;;  %v1970_v3 = vshll.u32 %v5600_v49, 16 }
 0x13d   : > { %v1954_v24 = vrot.slane %v1953_v55, 4  ;;  %v1958_v29 = vrot.slane %v1956_v51, 5  ;;  %v1989_v31 = vshrl.u32 %v1891_v0, 16  ;;  %v1992_v27 = vshll.u32 %v1891_v0, 16  ;;  %v5612_v2 = vld [vmem:[#allocation2 + $0x2c] sm:$0x1] }
 0x13e   : > { %v4269_v42 = vcombine.low %v5579_v18, %v1891_v0  ;;  %4851 = vmatpush3.bf16.msra.mxu0 %v5064_v38  ;;  %v1945_v44 = vsel %vm5259_vm4, %v1940_v19, %v1944_v21  ;;  %v2019_v32 = vrot.slane %v2017_v61, 4  ;;  %v2022_v33 = vrot.slane %v2020_v48, 5  ;;  %v5073_v34 = vld [vmem:[%s6091_s3 + $0xd8] sm:$0xff]   ;;  %v5070_v5 = vld [vmem:[#allocation2 + $0x8] ss:$8 sps:$4 sm:$0xff]  }
 0x13f   : > { %v4255_v45 = vcombine.low %v1931_v39, %v1945_v44  ;;  %4852 = vmatprep.subr.bf16.mxu0 %v5067_v40  ;;  %v1959_v4 = vsel %vm5259_vm4, %v1954_v24, %v1958_v29  ;;  %v1991_v54 = vrot.slane %v1989_v31, 4  ;;  %v1994_v47 = vrot.slane %v1992_v27, 5  ;;  %v5074_v55 = vld [vmem:[%s6091_s3 + $0xa8] sm:$0xff]   ;;  %v5078_v27 = vld [vmem:[%s6091_s3 + $0x98] sm:$0xff]   ;;  %v5080_v44 = vld [vmem:[%s6091_s3 + $0x90] sm:$0xff]  }
 0x140   : > { %4820 = vmatprep.mubr.bf16.mxu0 %v4269_v42  ;;  %v1968_v7 = vrot.slane %v1967_v30, 4  ;;  %v1972_v13 = vrot.slane %v1970_v3, 5  ;;  %v1981_v35 = vor.u32 %v1980_v20, %v1977_v52  ;;  %v1984_v39 = vshll.u32 %v5606_v63, 16  ;;  %v5079_v42 = vld [vmem:[%s6091_s3 + $0xc0] sm:$0xff]  }
 0x141   : > { %4792 = vmatprep.mubr.bf16.mxu1 %v4255_v45  ;;  %v1998_v18 = vshll.u32 %v5612_v2, 16  ;;  %v2342_v6 = vrot.slane %v5517_v1, 5  ;;  %v1995_v43 = vor.u32 %v1994_v47, %v1991_v54  ;;  %v2023_v36 = vor.u32 %v2022_v33, %v2019_v32  ;;  %v2314_v1 = vld [vmem:[#allocation2 + $0x8] sm:$0xe]  ;;  %v5082_v45 = vld [vmem:[%s6091_s3 + $0x178] sm:$0xff]   ;;  %v5085_v54 = vld [vmem:[%s6091_s3 + $0x170] sm:$0xff]  }
 0x142   : > { %v1892_v9 = vld [vmem:[#allocation2 + $0x30] sm:$0xf]  ;;  %4853 = vmatpush3.bf16.msra.mxu0 %v5067_v40  ;;  %v1973_v26 = vsel %vm5259_vm4, %v1968_v7, %v1972_v13  ;;  %v5635_v41 = vld [vmem:[#allocation2 + $0x34] sm:$0x1]  ;;  %v1982_v50 = vrot.slane %v1981_v35, 4  ;;  %v1986_v57 = vrot.slane %v1984_v39, 5 }
 0x143   : > { %v2003_v37 = vshrl.u32 %v1892_v9, 16  ;;  %v2006_v38 = vshll.u32 %v1892_v9, 16  ;;  %v4270_v28 = vcombine.low %v1892_v9, %v1893_v22  ;;  %v4256_v10 = vcombine.low %v1959_v4, %v1973_v26  ;;  %4854 = vmatprep.subr.bf16.mxu0 %v5071_v23  ;;  %v5083_v32 = vld [vmem:[%s6091_s3 + $0x88] sm:$0xff]   ;;  %v5081_v33 = vld [vmem:[#allocation2 + $0x18] ss:$8 sps:$4 sm:$0xff]  }
 0x144   : > { %v1996_v58 = vrot.slane %v1995_v43, 4  ;;  %v2000_v60 = vrot.slane %v1998_v18, 5  ;;  %v2012_v16 = vshll.u32 %v5635_v41, 16  ;;  %v2026_v62 = vshll.u32 %v5637_v12, 16  ;;  %v2315_v4 = vld [vmem:[#allocation2 + $0x10] sm:$0xe] }
 0x145   : > { %v2005_v59 = vrot.slane %v2003_v37, 4  ;;  %v2008_v8 = vrot.slane %v2006_v38, 5  ;;  %4821 = vmatmul.mubr.bf16.gmra.mxu0 %v4270_v28  ;;  %4793 = vmatmul.mubr.bf16.vlgmr.msra.gmra.mxu1 %v4256_v10  ;;  %v1987_v14 = vsel %vm5259_vm4, %v1982_v50, %v1986_v57  ;;  %v4280_v20 = vrot.slane %v2314_v1, 9  ;;  %v2316_v47 = vld [vmem:[#allocation2 + $0x18] sm:$0xe]  ;;  %v5086_v26 = vld [vmem:[%s6091_s3 + $0x80] sm:$0xff]  }
 0x146   : > { %4825 = vmatpush3.bf16.msra.mxu1 %v5481_v25  ;;  %4864 = vmatprep.mubr.bf16.mxu0 %v5070_v5  ;;  %v2001_v52 = vsel %vm5259_vm4, %v1996_v58, %v2000_v60  ;;  %v2346_v40 = vrot.slane %v5584_v11, 5  ;;  %v2024_v19 = vrot.slane %v2023_v36, 4  ;;  %v5075_v25 = vld [vmem:[%s6091_s3 + $0xd0] sm:$0xff]   ;;  %v2014_v61 = vrot.slane %v2012_v16, 5  ;;  %v5693_v7 = vld [vmem:[#allocation2 + $0xc] sm:$0x1] }
 0x147   : > { %4826 = vmatprep.subr.bf16.mxu1 %v5072_v15  ;;  %4855 = vmatpush3.bf16.msra.mxu0 %v5071_v23  ;;  %v4257_v22 = vcombine.low %v1987_v14, %v2001_v52  ;;  %v2009_v51 = vor.u32 %v2008_v8, %v2005_v59  ;;  %v2028_v48 = vrot.slane %v2026_v62, 5  ;;  %v2343_v0 = vsel %vm5655_vm13, %v4279_v56, %v2342_v6  ;;  %v5077_v56 = vld [vmem:[%s6091_s3 + $0xc8] sm:$0xff]   ;;  %v2698_v23 = vld [vmem:[#allocation2 + $0x10] sm:$0xf]  ;;  %v5695_v13 = vld [vmem:[#allocation2 + $0x14] sm:$0x1] }
 0x148   : > { %4856 = vmatprep.subr.bf16.mxu0 %v5073_v34  ;;  %v2347_v24 = vsel %vm5655_vm13, %v4280_v20, %v2346_v40  ;;  %v2696_v35 = vld [vmem:[#allocation2 + $0x8] sm:$0xf]  ;;  %v2727_v6 = vshrl.u32 %v2698_v23, 16  ;;  %v2730_v9 = vshll.u32 %v2698_v23, 16  ;;  %v4281_v37 = vrot.slane %v2315_v4, 9  ;;  %v5089_v20 = vld [vmem:[%s6091_s3 + $0x138] sm:$0xff]  }
 0x149   : > { %4796 = vmatprep.mubr.bf16.mxu1 %v4257_v22  ;;  %v2010_v21 = vrot.slane %v2009_v51, 4  ;;  %v2029_v30 = vsel %vm5259_vm4, %v2024_v19, %v2028_v48  ;;  %v4303_v31 = vcombine.low %v2343_v0, %v2347_v24  ;;  %v5084_v39 = vld [vmem:[#allocation2 + $0x28] ss:$8 sps:$4 sm:$0xff]   ;;  %v2350_v38 = vrot.slane %v5590_v53, 5  ;;  %v2317_v28 = vld [vmem:[#allocation2 + $0x20] sm:$0xe] }
 0x14a   : > { %4827 = vmatpush3.bf16.msra.mxu1 %v5072_v15  ;;  %v2979_v15 = vld [vmem:[#allocation2 + $0x10] sm:$0xe]  ;;  %v2978_v18 = vld [vmem:[#allocation2 + $0x8] sm:$0xe]  ;;  %v2713_v10 = vshrl.u32 %v2696_v35, 16  ;;  %v2716_v1 = vshll.u32 %v2696_v35, 16 }
 0x14b   : > { %4828 = vmatprep.subr.bf16.mxu1 %v5074_v55  ;;  %4857 = vmatpush3.bf16.msra.mxu0 %v5073_v34  ;;  %v2015_v29 = vsel %vm5259_vm4, %v2010_v21, %v2014_v61  ;;  %v4372_v43 = vrot.slane %v2979_v15, 9  ;;  %v3008_v34 = vrot.slane %v5695_v13, 5  ;;  %v2318_v36 = vld [vmem:[#allocation2 + $0x28] sm:$0xe]  ;;  %v4282_v5 = vrot.slane %v2316_v47, 9  ;;  %v5090_v21 = vld [vmem:[%s6091_s3 + $0x160] sm:$0xff]  }
 0x14c   : > { %v4258_v3 = vcombine.low %v2015_v29, %v2029_v30  ;;  %4858 = vmatprep.subr.bf16.mxu0 %v5075_v25  ;;  %v2354_v50 = vrot.slane %v5600_v49, 5  ;;  %v4371_v57 = vrot.slane %v2978_v18, 9  ;;  %v3004_v58 = vrot.slane %v5693_v7, 5  ;;  %v5088_v60 = vld [vmem:[%s6091_s3 + $0x168] sm:$0xff]   ;;  %v2319_v51 = vld [vmem:[#allocation2 + $0x30] sm:$0xe] }
 0x14d   : > { %v4284_v59 = vrot.slane %v2318_v36, 9  ;;  %v2362_v8 = vrot.slane %v5612_v2, 5  ;;  %v2729_v16 = vrot.slane %v2727_v6, 4  ;;  %v2732_v53 = vrot.slane %v2730_v9, 5  ;;  %v5087_v2 = vld [vmem:[#allocation2 + $0x38] ss:$8 sps:$4 sm:$0xff]  }
 0x14e   : > { %4797 = vmatmul.mubr.bf16.gmra.mxu1 %v4258_v3  ;;  %v3009_v62 = vsel %vm5655_vm13, %v4372_v43, %v3008_v34  ;;  %v4283_v14 = vrot.slane %v2317_v28, 9  ;;  %v2358_v49 = vrot.slane %v5606_v63, 5  ;;  %v2351_v52 = vsel %vm5655_vm13, %v4281_v37, %v2350_v38  ;;  %v2320_v24 = vld [vmem:[#allocation2 + $0x38] sm:$0xe]  ;;  %v5091_v29 = vld [vmem:[%s6091_s3 + $0x130] sm:$0xff]   ;;  %v5095_v43 = vld [vmem:[%s6091_s3 + $0x120] sm:$0xff]  }
 0x14f   : > { %4829 = vmatpush3.bf16.msra.mxu1 %v5074_v55  ;;  %4840 = vmatprep.mubr.bf16.mxu1 %v4303_v31  ;;  %v2715_v40 = vrot.slane %v2713_v10, 4  ;;  %v2718_v22 = vrot.slane %v2716_v1, 5  ;;  %v3005_v55 = vsel %vm5655_vm13, %v4371_v57, %v3004_v58  ;;  %v2355_v63 = vsel %vm5655_vm13, %v4282_v5, %v2354_v50  ;;  %v5742_v47 = vld [vmem:[#allocation2 + $0x1c] sm:$0x1]  ;;  %v5753_v9 = vld [vmem:[#allocation2 + $0x2c] sm:$0x1] }
 0x150   : > { %4830 = vmatprep.subr.bf16.mxu1 %v5076_v17  ;;  %4859 = vmatpush3.bf16.msra.mxu0 %v5075_v25  ;;  %v4395_v19 = vcombine.low %v3005_v55, %v3009_v62  ;;  %v2363_v25 = vsel %vm5655_vm13, %v4284_v59, %v2362_v8  ;;  %v2733_v61 = vor.u32 %v2732_v53, %v2729_v16  ;;  %v4285_v30 = vrot.slane %v2319_v51, 9  ;;  %v2982_v38 = vld [vmem:[#allocation2 + $0x28] sm:$0xe]  ;;  %v3359_v1 = vld [vmem:[#allocation2 + $0x10] sm:$0xf]  ;;  %v5097_v16 = vld [vmem:[%s6091_s3 + $0x118] sm:$0xff]  }
 0x151   : > { %4860 = vmatprep.subr.bf16.mxu0 %v5077_v56  ;;  %v4304_v48 = vcombine.low %v2351_v52, %v2355_v63  ;;  %v2359_v0 = vsel %vm5655_vm13, %v4283_v14, %v2358_v49  ;;  %v2366_v3 = vrot.slane %v5635_v41, 5  ;;  %v2736_v31 = vshll.u32 %v5695_v13, 16  ;;  %v5096_v10 = vld [vmem:[%s6091_s3 + $0x148] sm:$0xff]   ;;  %v5765_v5 = vld [vmem:[#allocation2 + $0x34] sm:$0x1]  ;;  %v5098_v53 = vld [vmem:[%s6091_s3 + $0x140] sm:$0xff]  }
 0x152   : > { %v3012_v34 = vrot.slane %v5742_v47, 5  ;;  %v2983_v50 = vld [vmem:[#allocation2 + $0x30] sm:$0xe]  ;;  %v2702_v57 = vld [vmem:[#allocation2 + $0x20] sm:$0xf]  ;;  %v4375_v58 = vrot.slane %v2982_v38, 9 }
 0x153   : > { %4831 = vmatpush3.bf16.msra.mxu1 %v5076_v17  ;;  %v2719_v17 = vor.u32 %v2718_v22, %v2715_v40  ;;  %v2367_v41 = vsel %vm5655_vm13, %v4285_v30, %v2366_v3  ;;  %v2738_v23 = vrot.slane %v2736_v31, 5  ;;  %v3361_v59 = vld [vmem:[#allocation2 + $0x18] sm:$0xf]  ;;  %v2706_v8 = vld [vmem:[#allocation2 + $0x30] sm:$0xf]  ;;  %v3376_v52 = vshrl.u32 %v3359_v1, 16 }
 0x154   : > { %4832 = vmatprep.subr.bf16.mxu1 %v5078_v27  ;;  %4861 = vmatpush3.bf16.msra.mxu0 %v5077_v56  ;;  %v4305_v56 = vcombine.low %v2359_v0, %v2363_v25  ;;  %v2700_v49 = vld [vmem:[#allocation2 + $0x18] sm:$0xf]  ;;  %v4376_v40 = vrot.slane %v2983_v50, 9  ;;  %v3024_v22 = vrot.slane %v5765_v5, 5  ;;  %v2758_v55 = vshll.u32 %v2702_v57, 16 }
 0x155   : > { %4862 = vmatprep.subr.bf16.mxu0 %v5079_v42  ;;  %v2720_v4 = vrot.slane %v2719_v17, 4  ;;  %v2704_v51 = vld [vmem:[#allocation2 + $0x28] sm:$0xf]  ;;  %v5783_v63 = vld [vmem:[#allocation2 + $0x38] sm:$0xe]  ;;  %v3393_v25 = vshll.u32 %v3361_v59, 16 }
 0x156   : > { %v2741_v30 = vshrl.u32 %v2700_v49, 16  ;;  %v2744_v3 = vshll.u32 %v2700_v49, 16  ;;  %v2985_v17 = vld [vmem:[#allocation2 + $0x40] sm:$0xe]  ;;  %v3378_v31 = vrot.slane %v3376_v52, 4 }
 0x157   : > { %4833 = vmatpush3.bf16.msra.mxu1 %v5078_v27  ;;  %v5092_v27 = vld [vmem:[%s6091_s3 + $0x158] sm:$0xff]  }
 0x158   : > { %4834 = vmatprep.subr.bf16.mxu1 %v5080_v44  ;;  %4863 = vmatpush3.bf16.msra.mxu0 %v5079_v42  ;;  %v4286_v42 = vrot.slane %v2320_v24, 9  ;;  %v5809_v50 = vld [vmem:[#allocation2 + $0x1c] sm:$0x1]  ;;  %v5121_v46 = vld [vmem:[#allocation2 + $0x30] ss:$8 sps:$4 sm:$0xff]  }
 0x159   : > { %4896 = vmatprep.subr.bf16.mxu0 %v5082_v45 }
 0x15b   : > { %4835 = vmatpush3.bf16.msra.mxu1 %v5080_v44  ;;  %4865 = vmatmul.mubr.bf16.vlgmr.msra.gmra.mxu0 %v5081_v33  ;;  %v2370_v44 = vrot.slane %v5637_v12, 5  ;;  %v5093_v33 = vld [vmem:[%s6091_s3 + $0x128] sm:$0xff]   ;;  %v5744_v12 = vld [vmem:[#allocation2 + $0x24] sm:$0x1] }
 0x15c   : > { %4836 = vmatprep.subr.bf16.mxu1 %v5083_v32  ;;  %4868 = vmatprep.mubr.bf16.mxu0 %v5084_v39  ;;  %v5094_v39 = vld [vmem:[%s6091_s3 + $0x150] sm:$0xff]   ;;  %v3016_v37 = vrot.slane %v5744_v12, 5 }
 0x15d   : > { %4897 = vmatpush3.bf16.msra.mxu0 %v5082_v45  ;;  %v2722_v45 = vshll.u32 %v5693_v7, 16  ;;  %v2981_v7 = vld [vmem:[#allocation2 + $0x20] sm:$0xe]  ;;  %v2371_v13 = vsel %vm5655_vm13, %v4286_v42, %v2370_v44  ;;  %v2772_v42 = vshll.u32 %v2704_v51, 16  ;;  %v5100_v44 = vld [vmem:[%s6091_s3 + $0x1f8] sm:$0xff]  }
 0x15e   : > { %4898 = vmatprep.subr.bf16.mxu0 %v5085_v54  ;;  %v4306_v18 = vcombine.low %v2367_v41, %v2371_v13  ;;  %v4374_v36 = vrot.slane %v2981_v7, 9  ;;  %v4377_v41 = vrot.slane %v5783_v63, 9  ;;  %v5106_v63 = vld [vmem:[%s6091_s3 + $0x1e0] sm:$0xff]  }
 0x15f   : > { %4837 = vmatpush3.bf16.msra.mxu1 %v5083_v32  ;;  %v2734_v32 = vrot.slane %v2733_v61, 4  ;;  %v2724_v15 = vrot.slane %v2722_v45, 5  ;;  %v2786_v61 = vshll.u32 %v2706_v8, 16  ;;  %v3025_v45 = vsel %vm5655_vm13, %v4376_v40, %v3024_v22 }
 0x160   : > { %4838 = vmatprep.subr.bf16.mxu1 %v5086_v26  ;;  %v5780_v14 = vsel %vm5655_vm13, %v4374_v36, %v3016_v37  ;;  %v2774_v38 = vrot.slane %v2772_v42, 5  ;;  %v3399_v22 = vshll.u32 %v5809_v50, 16 }
 0x161   : > { %4899 = vmatpush3.bf16.msra.mxu0 %v5085_v54  ;;  %v2980_v54 = vld [vmem:[#allocation2 + $0x18] sm:$0xe]  ;;  %v2739_v35 = vsel %vm5259_vm4, %v2734_v32, %v2738_v23  ;;  %v5799_v32 = vld [vmem:[#allocation2 + $0x44] sm:$0x1]  ;;  %v2788_v13 = vrot.slane %v2786_v61, 5 }
 0x162   : > { %4900 = vmatprep.subr.bf16.mxu0 %v5088_v60  ;;  %v4373_v6 = vrot.slane %v2980_v54, 9  ;;  %v3395_v54 = vrot.slane %v3393_v25, 5  ;;  %v5104_v25 = vld [vmem:[%s6091_s3 + $0x1e8] sm:$0xff]  }
 0x163   : > { %4839 = vmatpush3.bf16.msra.mxu1 %v5086_v26  ;;  %4869 = vmatmul.mubr.bf16.gmra.mxu0 %v5087_v2  ;;  %v2725_v26 = vsel %vm5259_vm4, %v2720_v4, %v2724_v15  ;;  %v2755_v2 = vshrl.u32 %v2702_v57, 16  ;;  %v2760_v4 = vrot.slane %v2758_v55, 5  ;;  %v2710_v15 = vld [vmem:[#allocation2 + $0x40] sm:$0xf] }
 0x164   : > { %4872 = vmatprep.subr.bf16.mxu1 %v5089_v20  ;;  %4912 = vmatprep.mubr.bf16.mxu0 %v4395_v19  ;;  %v4359_v28 = vcombine.low %v2725_v26, %v2739_v35  ;;  %v5776_v62 = vsel %vm5655_vm13, %v4373_v6, %v3012_v34  ;;  %v3390_v19 = vshrl.u32 %v3361_v59, 16  ;;  %v2746_v6 = vrot.slane %v2744_v3, 5  ;;  %v5803_v26 = vld [vmem:[#allocation2 + $0x14] sm:$0x1] }
 0x165   : > { %4901 = vmatpush3.bf16.msra.mxu0 %v5088_v60  ;;  %v3020_v60 = vrot.slane %v5753_v9, 5  ;;  %v4396_v0 = vcombine.low %v5776_v62, %v5780_v14  ;;  %v3032_v34 = vrot.slane %v5799_v32, 5  ;;  %v2811_v57 = vshrl.u32 %v2710_v15, 16 }
 0x166   : > { %4841 = vmatmul.mubr.bf16.vlgmr.msra.gmra.mxu1 %v4304_v48  ;;  %4902 = vmatprep.subr.bf16.mxu0 %v5090_v21  ;;  %v5099_v48 = vld [vmem:[%s6091_s3 + $0x110] sm:$0xff]   ;;  %v3392_v23 = vrot.slane %v3390_v19, 4  ;;  %v2750_v59 = vshll.u32 %v5742_v47, 16 }
 0x167   : > { %4844 = vmatprep.mubr.bf16.mxu1 %v4305_v56  ;;  %4873 = vmatpush3.bf16.msra.mxu1 %v5089_v20  ;;  %v3379_v20 = vshll.u32 %v3359_v1, 16  ;;  %v3021_v24 = vsel %vm5655_vm13, %v4375_v58, %v3020_v60  ;;  %v2814_v58 = vshll.u32 %v2710_v15, 16  ;;  %v5102_v60 = vld [vmem:[%s6091_s3 + $0x1f0] sm:$0xff]  }
 0x168   : > { %4874 = vmatprep.subr.bf16.mxu1 %v5091_v29 }
 0x169   : > { %4903 = vmatpush3.bf16.msra.mxu0 %v5090_v21  ;;  %v2783_v21 = vshrl.u32 %v2706_v8, 16  ;;  %v3381_v56 = vrot.slane %v3379_v20, 5  ;;  %v3385_v8 = vshll.u32 %v5803_v26, 16  ;;  %v5103_v20 = vld [vmem:[%s6091_s3 + $0x100] sm:$0xff]   ;;  %v2816_v19 = vrot.slane %v2814_v58, 5 }
 0x16a   : > { %4904 = vmatprep.subr.bf16.mxu0 %v5092_v27 }
 0x16b   : > { %4875 = vmatpush3.bf16.msra.mxu1 %v5091_v29  ;;  %v5792_v29 = vld [vmem:[#allocation2 + $0x3c] sm:$0x1]  ;;  %v2785_v7 = vrot.slane %v2783_v21, 4  ;;  %v3382_v36 = vor.u32 %v3381_v56, %v3378_v31  ;;  %v3387_v21 = vrot.slane %v3385_v8, 5  ;;  %v3401_v56 = vrot.slane %v3399_v22, 5 }
 0x16c   : > { %4876 = vmatprep.subr.bf16.mxu1 %v5093_v33  ;;  %v3028_v35 = vrot.slane %v5792_v29, 5 }
 0x16d   : > { %4905 = vmatpush3.bf16.msra.mxu0 %v5092_v27  ;;  %v2769_v27 = vshrl.u32 %v2704_v51, 16  ;;  %v2789_v62 = vor.u32 %v2788_v13, %v2785_v7  ;;  %v3383_v40 = vrot.slane %v3382_v36, 4  ;;  %v2813_v51 = vrot.slane %v2811_v57, 4 }
 0x16e   : > { %4845 = vmatmul.mubr.bf16.gmra.mxu1 %v4306_v18  ;;  %4906 = vmatprep.subr.bf16.mxu0 %v5094_v39  ;;  %v2743_v18 = vrot.slane %v2741_v30, 4  ;;  %v2806_v36 = vshll.u32 %v5792_v29, 16  ;;  %v5109_v29 = vld [vmem:[%s6091_s3 + $0x1a8] sm:$0xff]  }
 0x16f   : > { %4877 = vmatpush3.bf16.msra.mxu1 %v5093_v33  ;;  %4888 = vmatprep.mubr.bf16.mxu1 %v4359_v28  ;;  %v2757_v33 = vrot.slane %v2755_v2, 4  ;;  %v2771_v37 = vrot.slane %v2769_v27, 4  ;;  %v2708_v28 = vld [vmem:[#allocation2 + $0x38] sm:$0xf]  ;;  %v2792_v2 = vshll.u32 %v5765_v5, 16  ;;  %v3388_v31 = vsel %vm5259_vm4, %v3383_v40, %v3387_v21 }
 0x170   : > { %4878 = vmatprep.subr.bf16.mxu1 %v5095_v43  ;;  %v2747_v14 = vor.u32 %v2746_v6, %v2743_v18  ;;  %v2797_v49 = vshrl.u32 %v2708_v28, 16  ;;  %v2800_v52 = vshll.u32 %v2708_v28, 16  ;;  %v5107_v6 = vld [vmem:[%s6091_s3 + $0x1b0] sm:$0xff]   ;;  %v3363_v28 = vld [vmem:[#allocation2 + $0x20] sm:$0xf] }
 0x171   : > { %4907 = vmatpush3.bf16.msra.mxu0 %v5094_v39  ;;  %v4378_v39 = vrot.slane %v2985_v17, 9  ;;  %v2761_v1 = vor.u32 %v2760_v4, %v2757_v33  ;;  %v2775_v47 = vor.u32 %v2774_v38, %v2771_v37  ;;  %v5105_v17 = vld [vmem:[%s6091_s3 + $0x1b8] sm:$0xff]   ;;  %v2794_v42 = vrot.slane %v2792_v2, 5  ;;  %v3367_v38 = vld [vmem:[#allocation2 + $0x30] sm:$0xf] }
 0x172   : > { %4908 = vmatprep.subr.bf16.mxu0 %v5096_v10  ;;  %v2748_v5 = vrot.slane %v2747_v14, 4  ;;  %v2799_v30 = vrot.slane %v2797_v49, 4  ;;  %v2802_v3 = vrot.slane %v2800_v52, 5  ;;  %v2817_v33 = vor.u32 %v2816_v19, %v2813_v51  ;;  %v5111_v49 = vld [vmem:[%s6091_s3 + $0x1d0] sm:$0xff]   ;;  %v3373_v40 = vld [vmem:[#allocation2 + $0x48] sm:$0xf] }
 0x173   : > { %4879 = vmatpush3.bf16.msra.mxu1 %v5095_v43  ;;  %v5101_v43 = vld [vmem:[%s6091_s3 + $0x108] sm:$0xff]   ;;  %v3033_v55 = vsel %vm5655_vm13, %v4378_v39, %v3032_v34  ;;  %v2776_v27 = vrot.slane %v2775_v47, 4  ;;  %v3435_v8 = vshll.u32 %v3367_v38, 16  ;;  %v3404_v14 = vshrl.u32 %v3363_v28, 16  ;;  %v5110_v21 = vld [vmem:[#allocation2 + $0x10] ss:$8 sps:$4 sm:$0xff]  }
 0x174   : > { %4880 = vmatprep.subr.bf16.mxu1 %v5097_v16  ;;  %v2803_v15 = vor.u32 %v2802_v3, %v2799_v30  ;;  %v2818_v37 = vrot.slane %v2817_v33, 4 }
 0x175   : > { %4909 = vmatpush3.bf16.msra.mxu0 %v5096_v10  ;;  %v4397_v10 = vcombine.low %v3021_v24, %v3025_v45  ;;  %v3437_v19 = vrot.slane %v3435_v8, 5  ;;  %v5117_v8 = vld [vmem:[%s6091_s3 + $0x188] sm:$0xff]  }
 0x176   : > { %4910 = vmatprep.subr.bf16.mxu0 %v5098_v53 }
 0x177   : > { %4881 = vmatpush3.bf16.msra.mxu1 %v5097_v16  ;;  %v3396_v16 = vor.u32 %v3395_v54, %v3392_v23 }
 0x178   : > { %4882 = vmatprep.subr.bf16.mxu1 %v5099_v48 }
 0x179   : > { %4911 = vmatpush3.bf16.msra.mxu0 %v5098_v53  ;;  %v2764_v53 = vshll.u32 %v5744_v12, 16  ;;  %v2762_v12 = vrot.slane %v2761_v1, 4  ;;  %v3397_v61 = vrot.slane %v3396_v16, 4  ;;  %v2808_v16 = vrot.slane %v2806_v36, 5 }
 0x17a   : > { %4944 = vmatprep.subr.bf16.mxu0 %v5100_v44 }
 0x17b   : > { %4883 = vmatpush3.bf16.msra.mxu1 %v5099_v48  ;;  %v2778_v48 = vshll.u32 %v5753_v9, 16  ;;  %v2766_v24 = vrot.slane %v2764_v53, 5  ;;  %v3029_v9 = vsel %vm5655_vm13, %v4377_v41, %v3028_v35  ;;  %v3402_v23 = vsel %vm5259_vm4, %v3397_v61, %v3401_v56  ;;  %v5876_v56 = vld [vmem:[#allocation2 + $0x34] sm:$0x1] }
 0x17c   : > { %4913 = vmatmul.mubr.bf16.vlgmr.msra.gmra.mxu0 %v4396_v0  ;;  %4884 = vmatprep.subr.bf16.mxu1 %v5101_v43  ;;  %v2790_v0 = vrot.slane %v2789_v62, 4  ;;  %v4398_v4 = vcombine.low %v3029_v9, %v3033_v55  ;;  %v4451_v13 = vcombine.low %v3388_v31, %v3402_v23  ;;  %v2820_v35 = vshll.u32 %v5799_v32, 16  ;;  %v5108_v32 = vld [vmem:[%s6091_s3 + $0x1d8] sm:$0xff]  }
 0x17d   : > { %4916 = vmatprep.mubr.bf16.mxu0 %v4397_v10  ;;  %4945 = vmatpush3.bf16.msra.mxu0 %v5100_v44  ;;  %v2752_v44 = vrot.slane %v2750_v59, 5  ;;  %v2767_v45 = vsel %vm5259_vm4, %v2762_v12, %v2766_v24  ;;  %v2780_v54 = vrot.slane %v2778_v48, 5  ;;  %v2804_v10 = vrot.slane %v2803_v15, 4  ;;  %v5112_v12 = vld [vmem:[%s6091_s3 + $0x1a0] sm:$0xff]   ;;  %v5874_v24 = vld [vmem:[#allocation2 + $0x2c] sm:$0x1] }
 0x17e   : > { %4946 = vmatprep.subr.bf16.mxu0 %v5102_v60  ;;  %v2795_v7 = vsel %vm5259_vm4, %v2790_v0, %v2794_v42  ;;  %v2822_v1 = vrot.slane %v2820_v35, 5  ;;  %v3432_v59 = vshrl.u32 %v3367_v38, 16  ;;  %v3407_v53 = vshll.u32 %v3363_v28, 16  ;;  %v5114_v9 = vld [vmem:[%s6091_s3 + $0x198] sm:$0xff]   ;;  %v5895_v28 = vld [vmem:[#allocation2 + $0x44] sm:$0x1] }
 0x17f   : > { %4885 = vmatpush3.bf16.msra.mxu1 %v5101_v43  ;;  %v2753_v41 = vsel %vm5259_vm4, %v2748_v5, %v2752_v44  ;;  %v2781_v18 = vsel %vm5259_vm4, %v2776_v27, %v2780_v54  ;;  %v3365_v43 = vld [vmem:[#allocation2 + $0x28] sm:$0xf]  ;;  %v2809_v22 = vsel %vm5259_vm4, %v2804_v10, %v2808_v16  ;;  %v3406_v61 = vrot.slane %v3404_v14, 4  ;;  %v5881_v44 = vld [vmem:[#allocation2 + $0x24] sm:$0x1] }
 0x180   : > { %4886 = vmatprep.subr.bf16.mxu1 %v5103_v20  ;;  %v4360_v39 = vcombine.low %v2753_v41, %v2767_v45  ;;  %v4361_v34 = vcombine.low %v2781_v18, %v2795_v7  ;;  %v3418_v57 = vshrl.u32 %v3365_v43, 16  ;;  %v3421_v58 = vshll.u32 %v3365_v43, 16  ;;  %v5113_v5 = vld [vmem:[%s6091_s3 + $0x1c8] sm:$0xff]   ;;  %v5884_v23 = vld [vmem:[#allocation2 + $0x3c] sm:$0x1]  ;;  %v5115_v54 = vld [vmem:[%s6091_s3 + $0x1c0] sm:$0xff]  }
 0x181   : > { %4947 = vmatpush3.bf16.msra.mxu0 %v5102_v60  ;;  %v3369_v60 = vld [vmem:[#allocation2 + $0x38] sm:$0xf]  ;;  %v2823_v62 = vsel %vm5259_vm4, %v2818_v37, %v2822_v1  ;;  %v3434_v51 = vrot.slane %v3432_v59, 4  ;;  %v3409_v48 = vrot.slane %v3407_v53, 5  ;;  %v3474_v0 = vshrl.u32 %v3373_v40, 16 }
 0x182   : > { %4948 = vmatprep.subr.bf16.mxu0 %v5104_v25  ;;  %v3446_v52 = vshrl.u32 %v3369_v60, 16  ;;  %v3420_v47 = vrot.slane %v3418_v57, 4  ;;  %v3423_v2 = vrot.slane %v3421_v58, 5  ;;  %v4362_v55 = vcombine.low %v2809_v22, %v2823_v62  ;;  %v5897_v10 = vld [vmem:[#allocation2 + $0x4c] sm:$0x1] }
 0x183   : > { %4887 = vmatpush3.bf16.msra.mxu1 %v5103_v20  ;;  %v3449_v20 = vshll.u32 %v3369_v60, 16  ;;  %v3438_v45 = vor.u32 %v3437_v19, %v3434_v51  ;;  %v3410_v33 = vor.u32 %v3409_v48, %v3406_v61  ;;  %v3441_v7 = vshll.u32 %v5876_v56, 16  ;;  %v3859_v59 = vld [vmem:[%s6093_s5] sm:$0x3]  ;;  %v3641_v48 = vld [vmem:[#allocation2 + $0x10] sm:$0xe] }
 0x184   : > { %4917 = vmatmul.mubr.bf16.gmra.mxu0 %v4398_v4  ;;  %4920 = vmatprep.subr.bf16.mxu1 %v5105_v17  ;;  %v3448_v30 = vrot.slane %v3446_v52, 4  ;;  %v3424_v31 = vor.u32 %v3423_v2, %v3420_v47  ;;  %v3427_v4 = vshll.u32 %v5874_v24, 16  ;;  %v3476_v41 = vrot.slane %v3474_v0, 4  ;;  %v5119_v0 = vld [vmem:[#allocation2 + $0x20] ss:$8 sps:$4 sm:$0xff]  }
 0x185   : > { %4949 = vmatpush3.bf16.msra.mxu0 %v5104_v25  ;;  %4960 = vmatprep.mubr.bf16.mxu0 %v4451_v13  ;;  %v3371_v25 = vld [vmem:[#allocation2 + $0x40] sm:$0xf]  ;;  %v3451_v3 = vrot.slane %v3449_v20, 5  ;;  %v3413_v15 = vshll.u32 %v5881_v44, 16  ;;  %v3439_v43 = vrot.slane %v3438_v45, 4  ;;  %v3411_v36 = vrot.slane %v3410_v33, 4 }
 0x186   : > { %4889 = vmatmul.mubr.bf16.vlgmr.msra.gmra.mxu1 %v4360_v39  ;;  %4950 = vmatprep.subr.bf16.mxu0 %v5106_v63  ;;  %v3460_v27 = vshrl.u32 %v3371_v25, 16  ;;  %v3463_v42 = vshll.u32 %v3371_v25, 16  ;;  %v3425_v35 = vrot.slane %v3424_v31, 4  ;;  %v3429_v37 = vrot.slane %v3427_v4, 5  ;;  %v5120_v25 = vld [vmem:[%s6091_s3 + $0x238] sm:$0xff]   ;;  %v5124_v31 = vld [vmem:[%s6091_s3 + $0x228] sm:$0xff]  }
 0x187   : > { %4892 = vmatprep.mubr.bf16.mxu1 %v4361_v34  ;;  %4921 = vmatpush3.bf16.msra.mxu1 %v5105_v17  ;;  %v3477_v17 = vshll.u32 %v3373_v40, 16  ;;  %v3455_v34 = vshll.u32 %v5884_v23, 16  ;;  %v3443_v38 = vrot.slane %v3441_v7, 5  ;;  %v3415_v57 = vrot.slane %v3413_v15, 5  ;;  %v5132_v45 = vld [vmem:[%s5223_s19 + $0xf8] ss:$8 sps:$4 sm:$0xff]  }
 0x188   : > { %4922 = vmatprep.subr.bf16.mxu1 %v5107_v6  ;;  %v3462_v39 = vrot.slane %v3460_v27, 4  ;;  %v3465_v18 = vrot.slane %v3463_v42, 5  ;;  %v3430_v58 = vsel %vm5259_vm4, %v3425_v35, %v3429_v37  ;;  %v3469_v53 = vshll.u32 %v5895_v28, 16  ;;  %v5123_v4 = vld [vmem:[#allocation2 + $0x40] ss:$8 sps:$4 sm:$0xff]  }
 0x189   : > { %4951 = vmatpush3.bf16.msra.mxu0 %v5106_v63  ;;  %v3452_v63 = vor.u32 %v3451_v3, %v3448_v30  ;;  %v3479_v13 = vrot.slane %v3477_v17, 5  ;;  %v3444_v16 = vsel %vm5259_vm4, %v3439_v43, %v3443_v38  ;;  %v3457_v62 = vrot.slane %v3455_v34, 5  ;;  %v3642_v30 = vld [vmem:[#allocation2 + $0x18] sm:$0xe]  ;;  %v3644_v15 = vld [vmem:[#allocation2 + $0x28] sm:$0xe] }
 0x18a   : > { %4952 = vmatprep.subr.bf16.mxu0 %v5108_v32  ;;  %v3466_v60 = vor.u32 %v3465_v18, %v3462_v39  ;;  %v3416_v14 = vsel %vm5259_vm4, %v3411_v36, %v3415_v57  ;;  %v3893_v20 = vsel %vm338_vm0, %v3859_v59, 0  ;;  %v4463_v3 = vrot.slane %v3641_v48, 9  ;;  %v3645_v35 = vld [vmem:[#allocation2 + $0x30] sm:$0xe]  ;;  %v5129_v39 = vld [vmem:[%s6091_s3 + $0x200] sm:$0xff]  }
 0x18b   : > { %4923 = vmatpush3.bf16.msra.mxu1 %v5107_v6  ;;  %v5116_v6 = vld [vmem:[%s6091_s3 + $0x190] sm:$0xff]   ;;  %v3480_v1 = vor.u32 %v3479_v13, %v3476_v41  ;;  %v3667_v17 = vrot.slane %v5803_v26, 5  ;;  %v4464_v27 = vrot.slane %v3642_v30, 9  ;;  %v3671_v42 = vrot.slane %v5809_v50, 5  ;;  %v5126_v50 = vld [vmem:[%s6091_s3 + $0x218] sm:$0xff]   ;;  %v5128_v13 = vld [vmem:[%s6091_s3 + $0x208] sm:$0xff]  }
 0x18c   : > { %4924 = vmatprep.subr.bf16.mxu1 %v5109_v29  ;;  %v3467_v22 = vrot.slane %v3466_v60, 4  ;;  %v5127_v41 = vld [vmem:[%s6091_s3 + $0x210] sm:$0xff]   ;;  %v3643_v18 = vld [vmem:[#allocation2 + $0x20] sm:$0xe]  ;;  %v3679_v43 = vrot.slane %v5874_v24, 5  ;;  %v4467_v36 = vrot.slane %v3645_v35, 9 }
 0x18d   : > { %4953 = vmatpush3.bf16.msra.mxu0 %v5108_v32  ;;  %v3453_v32 = vrot.slane %v3452_v63, 4  ;;  %v3481_v47 = vrot.slane %v3480_v1, 4  ;;  %v3668_v33 = vsel %vm5655_vm13, %v4463_v3, %v3667_v17  ;;  %v3672_v26 = vsel %vm5655_vm13, %v4464_v27, %v3671_v42  ;;  %v5133_v63 = vld [vmem:[%s5223_s19 + $0x108] ss:$8 sps:$4 sm:$0xff]   ;;  %v3646_v34 = vld [vmem:[#allocation2 + $0x38] sm:$0xe] }
 0x18e   : > { %4893 = vmatmul.mubr.bf16.gmra.mxu1 %v4362_v55  ;;  %4954 = vmatprep.subr.bf16.mxu0 %v5111_v49  ;;  %v5118_v55 = vld [vmem:[%s6091_s3 + $0x180] sm:$0xff]   ;;  %v4487_v7 = vcombine.low %v3668_v33, %v3672_v26  ;;  %v3683_v37 = vrot.slane %v5876_v56, 5  ;;  %v4465_v38 = vrot.slane %v3643_v18, 9  ;;  %v4468_v1 = vrot.slane %v3646_v34, 9  ;;  %v3648_v60 = vld [vmem:[#allocation2 + $0x48] sm:$0xe] }
 0x18f   : > { %4925 = vmatpush3.bf16.msra.mxu1 %v5109_v29  ;;  %4936 = vmatprep.mubr.bf16.mxu1 %v5110_v21  ;;  %v3483_v29 = vshll.u32 %v5897_v10, 16  ;;  %v3458_v52 = vsel %vm5259_vm4, %v3453_v32, %v3457_v62  ;;  %v5130_v21 = vld [vmem:[%s5223_s19 + $0xd8] ss:$8 sps:$4 sm:$0xff]   ;;  %v3675_v32 = vrot.slane %v5881_v44, 5  ;;  %v3687_v57 = vrot.slane %v5884_v23, 5 }
 0x190   : > { %4926 = vmatprep.subr.bf16.mxu1 %v5112_v12  ;;  %v4453_v40 = vcombine.low %v3444_v16, %v3458_v52  ;;  %v3647_v24 = vld [vmem:[#allocation2 + $0x40] sm:$0xe]  ;;  %v3691_v23 = vrot.slane %v5895_v28, 5 }
 0x191   : > { %4955 = vmatpush3.bf16.msra.mxu0 %v5111_v49  ;;  %v4452_v49 = vcombine.low %v3416_v14, %v3430_v58  ;;  %v3485_v2 = vrot.slane %v3483_v29, 5  ;;  %v3684_v29 = vsel %vm5655_vm13, %v4467_v36, %v3683_v37  ;;  %v3676_v56 = vsel %vm5655_vm13, %v4465_v38, %v3675_v32 }
 0x192   : > { %4956 = vmatprep.subr.bf16.mxu0 %v5113_v5  ;;  %v3688_v44 = vsel %vm5655_vm13, %v4468_v1, %v3687_v57  ;;  %v4469_v62 = vrot.slane %v3647_v24, 9  ;;  %v3695_v14 = vrot.slane %v5897_v10, 5 }
 0x193   : > { %4927 = vmatpush3.bf16.msra.mxu1 %v5112_v12  ;;  %v3471_v12 = vrot.slane %v3469_v53, 5  ;;  %v3486_v19 = vsel %vm5259_vm4, %v3481_v47, %v3485_v2  ;;  %v4489_v16 = vcombine.low %v3684_v29, %v3688_v44 }
 0x194   : > { %4928 = vmatprep.subr.bf16.mxu1 %v5114_v9  ;;  %v3692_v53 = vsel %vm5655_vm13, %v4469_v62, %v3691_v23 }
 0x195   : > { %4957 = vmatpush3.bf16.msra.mxu0 %v5113_v5  ;;  %v3472_v51 = vsel %vm5259_vm4, %v3467_v22, %v3471_v12  ;;  %v5122_v5 = vld [vmem:[%s6091_s3 + $0x230] sm:$0xff]  }
 0x196   : > { %4958 = vmatprep.subr.bf16.mxu0 %v5115_v54  ;;  %v4454_v61 = vcombine.low %v3472_v51, %v3486_v19 }
 0x197   : > { %4929 = vmatpush3.bf16.msra.mxu1 %v5114_v9  ;;  %v5131_v9 = vld [vmem:[%s5223_s19 + $0xe8] ss:$8 sps:$4 sm:$0xff]  }
 0x198   : > { %4930 = vmatprep.subr.bf16.mxu1 %v5116_v6 }
 0x199   : > { %4959 = vmatpush3.bf16.msra.mxu0 %v5115_v54  ;;  %v5125_v54 = vld [vmem:[%s6091_s3 + $0x220] sm:$0xff]  }
 0x19a   : > { %5011 = vmatprep.subr.msk.bf16.mxu0 %vm338_vm0, %v3859_v59 }
 0x19b   : > { %4931 = vmatpush3.bf16.msra.mxu1 %v5116_v6  ;;  %v4466_v6 = vrot.slane %v3644_v15, 9 }
 0x19c   : > { %4961 = vmatmul.mubr.bf16.vlgmr.msra.gmra.mxu0 %v4452_v49  ;;  %4932 = vmatprep.subr.bf16.mxu1 %v5117_v8 }
 0x19d   : > { %4964 = vmatprep.mubr.bf16.mxu0 %v4453_v40  ;;  %4993 = vmatpush3.bf16.msra.mxu0 %v3893_v20  ;;  %v3680_v58 = vsel %vm5655_vm13, %v4466_v6, %v3679_v43 }
 0x19e   : > { %v4488_v59 = vcombine.low %v3676_v56, %v3680_v58 }
 0x19f   : > { %4933 = vmatpush3.bf16.msra.mxu1 %v5117_v8  ;;  %v4470_v8 = vrot.slane %v3648_v60, 9 }
 0x1a0   : > { %4934 = vmatprep.subr.bf16.mxu1 %v5118_v55 }
 0x1a1   : > { %v3696_v49 = vsel %vm5655_vm13, %v4470_v8, %v3695_v14 }
 0x1a2   : > { %v4490_v52 = vcombine.low %v3692_v53, %v3696_v49 }
 0x1a3   : > { %4935 = vmatpush3.bf16.msra.mxu1 %v5118_v55 }
 0x1a4   : > { %4965 = vmatmul.mubr.bf16.gmra.mxu0 %v4454_v61  ;;  %4968 = vmatprep.subr.bf16.mxu1 %v5120_v25 }
 0x1a5   : > { %4994 = vmatprep.mubr.msk.bf16.mxu0 %vm325_vm1, %v5130_v21 }
 0x1a6   : > { %4937 = vmatmul.mubr.bf16.vlgmr.msra.gmra.mxu1 %v5119_v0 }
 0x1a7   : > { %4940 = vmatprep.mubr.bf16.mxu1 %v5121_v46  ;;  %4969 = vmatpush3.bf16.msra.mxu1 %v5120_v25 }
 0x1a8   : > { %4970 = vmatprep.subr.bf16.mxu1 %v5122_v5 }
 0x1ab   : > { %4971 = vmatpush3.bf16.msra.mxu1 %v5122_v5 }
 0x1ac   : > { %4972 = vmatprep.subr.bf16.mxu1 %v5124_v31  ;;  %4995 = vmatmul.mubr.msk.bf16.vlgmr.msra.gmra.mxu0 %vm325_vm1, %v5131_v9 }
 0x1ad   : > { %4998 = vmatprep.mubr.msk.bf16.mxu0 %vm325_vm1, %v5132_v45 }
 0x1ae   : > { %4941 = vmatmul.mubr.bf16.gmra.mxu1 %v5123_v4 }
 0x1af   : > { %4973 = vmatpush3.bf16.msra.mxu1 %v5124_v31  ;;  %4984 = vmatprep.mubr.bf16.mxu1 %v4487_v7 }
 0x1b0   : > { %4974 = vmatprep.subr.bf16.mxu1 %v5125_v54 }
 0x1b3   : > { %4975 = vmatpush3.bf16.msra.mxu1 %v5125_v54 }
 0x1b4   : > { %4976 = vmatprep.subr.bf16.mxu1 %v5126_v50  ;;  %4999 = vmatmul.mubr.msk.bf16.gmra.mxu0 %vm325_vm1, %v5133_v63 }
 0x1b7   : > { %4977 = vmatpush3.bf16.msra.mxu1 %v5126_v50 }
 0x1b8   : > { %4978 = vmatprep.subr.bf16.mxu1 %v5127_v41 }
 0x1bb   : > { %4979 = vmatpush3.bf16.msra.mxu1 %v5127_v41 }
 0x1bc   : > { %4980 = vmatprep.subr.bf16.mxu1 %v5128_v13 }
 0x1bf   : > { %4981 = vmatpush3.bf16.msra.mxu1 %v5128_v13 }
 0x1c0   : > { %4982 = vmatprep.subr.bf16.mxu1 %v5129_v39 }
 0x1c3   : > { %4983 = vmatpush3.bf16.msra.mxu1 %v5129_v39 }
 0x1c6   : > { %4985 = vmatmul.mubr.bf16.vlgmr.msra.gmra.mxu1 %v4488_v59 }
 0x1c7   : > { %4988 = vmatprep.mubr.bf16.mxu1 %v4489_v16 }
 0x1ce   : > { %4989 = vmatmul.mubr.bf16.gmra.mxu1 %v4490_v52 }
 0x1f9   : > { %v4818_v20 = vpop.f32.mrf.mxu0 }
 0x1fb   : > { %v2282_v40 = vpop.f32.mrf.mxu0 }
 0x1fd   : > { %v4819_v22 = vpop.f32.mrf.mxu0 }
 0x1ff   : > { %v2285_v2 = vpop.f32.mrf.mxu0 }
 0x205   : > { %v4794_v47 = vpop.f32.mrf.mxu1  ;;  %v5980_v12 = vpop.f32.mrf.mxu0 }
 0x206   : > { %v2291_v16 = vadd.f32 %v4818_v20, %v4794_v47 }
 0x207   : > { %v2145_v55 = vpop.f32.mrf.mxu1  ;;  %v5982_v10 = vpop.f32.mrf.mxu0 }
 0x208   : > { %v2283_v23 = vadd.f32 %v2282_v40, %v2145_v55 }
 0x209   : > { %v4795_v28 = vpop.f32.mrf.mxu1  ;;  %v5984_v19 = vpop.f32.mrf.mxu0 }
 0x20a   : > { %v2294_v49 = vadd.f32 %v4819_v22, %v4795_v28 }
 0x20b   : > { %v2148_v51 = vpop.f32.mrf.mxu1  ;;  %v5986_v21 = vpop.f32.mrf.mxu0 }
 0x20e   : > { %v4798_v25 = vpop.f32.mrf.mxu1 }
 0x210   : > { %v2161_v11 = vpop.f32.mrf.mxu1 }
 0x211   : > { %v2299_v20 = vadd.f32 %v5982_v10, %v2161_v11 }
 0x212   : > { %v5988_v48 = vpop.f32.mrf.mxu1 }
 0x213   : > { %v2310_v22 = vadd.f32 %v5984_v19, %v5988_v48 }
 0x214   : > { %v5990_v5 = vpop.f32.mrf.mxu1 }
 0x21b   : > { %v4866_v61 = vpop.f32.mrf.mxu0 }
 0x21d   : > { %v2657_v0 = vpop.f32.mrf.mxu0 }
 0x21f   : > { %v4867_v46 = vpop.f32.mrf.mxu0 }
 0x221   : > { %v2660_v3 = vpop.f32.mrf.mxu0 }
 0x223   : > { %v5992_v31 = vpop.f32.mrf.mxu0 }
 0x225   : > { %v5994_v42 = vpop.f32.mrf.mxu0 }
 0x226   : > { %v4842_v30 = vpop.f32.mrf.mxu1 }
 0x227   : > { %v5996_v45 = vpop.f32.mrf.mxu0  ;;  %v2520_v14 = vadd.f32 %v4842_v30, %v2291_v16 }
 0x228   : > { %v2487_v17 = vpop.f32.mrf.mxu1 }
 0x229   : > { %v5998_v4 = vpop.f32.mrf.mxu0  ;;  %v2518_v52 = vadd.f32 %v2487_v17, %v2283_v23 }
 0x22a   : > { %v4843_v27 = vpop.f32.mrf.mxu1 }
 0x22c   : > { %v2490_v9 = vpop.f32.mrf.mxu1 }
 0x22e   : > { %v4846_v33 = vpop.f32.mrf.mxu1 }
 0x230   : > { %v2503_v26 = vpop.f32.mrf.mxu1 }
 0x232   : > { %v4847_v7 = vpop.f32.mrf.mxu1 }
 0x234   : > { %v2506_v63 = vpop.f32.mrf.mxu1 }
 0x23c   : > { %v4914_v54 = vpop.f32.mrf.mxu0 }
 0x23e   : > { %v3149_v50 = vpop.f32.mrf.mxu0 }
 0x240   : > { %v4915_v41 = vpop.f32.mrf.mxu0 }
 0x242   : > { %v6000_v15 = vpop.f32.mrf.mxu0 }
 0x244   : > { %v6002_v39 = vpop.f32.mrf.mxu0 }
 0x245   : > { %6104 = vst [vmem:[#allocation3_spill] sm:$0xff] %v6002_v39 }
 0x246   : > { %v4890_v13 = vpop.f32.mrf.mxu1  ;;  %v6004_v6 = vpop.f32.mrf.mxu0 }
 0x247   : > { %6105 = vst [vmem:[#allocation4_spill] sm:$0xff] %v6004_v6  ;;  %v2690_v6 = vadd.f32 %v4866_v61, %v2520_v14 }
 0x248   : > { %v2939_v35 = vpop.f32.mrf.mxu1  ;;  %v6006_v34 = vpop.f32.mrf.mxu0 }
 0x249   : > { %6106 = vst [vmem:[#allocation5_spill] sm:$0xff] %v6006_v34  ;;  %v2286_v34 = vadd.f32 %v2285_v2, %v2148_v51  ;;  %v2522_v2 = vadd.f32 %v2503_v26, %v2299_v20 }
 0x24a   : > { %v4891_v18 = vpop.f32.mrf.mxu1  ;;  %v6008_v37 = vpop.f32.mrf.mxu0 }
 0x24b   : > { %6107 = vst [vmem:[#allocation6_spill] sm:$0xff] %v6008_v37  ;;  %v2692_v19 = vadd.f32 %v5994_v42, %v2522_v2  ;;  %v6041_v42 = vld [vmem:[%s6092_s4] ss:$0 sm:$0xff] }
 0x24c   : > { %v2942_v43 = vpop.f32.mrf.mxu1 }
 0x24e   : > { %v4894_v36 = vpop.f32.mrf.mxu1 }
 0x250   : > { %v2955_v38 = vpop.f32.mrf.mxu1 }
 0x251   : > { %v2974_v26 = vadd.f32 %v2955_v38, %v2692_v19 }
 0x252   : > { %v4895_v1 = vpop.f32.mrf.mxu1 }
 0x254   : > { %v6012_v58 = vpop.f32.mrf.mxu1 }
 0x255   : > { %6109 = vst [vmem:[#allocation8_spill] sm:$0xff] %v6012_v58  ;;  %v2972_v58 = vadd.f32 %v4890_v13, %v2690_v6 }
 0x257   : > { %v3182_v17 = vadd.f32 %v4914_v54, %v2972_v58 }
 0x25c   : > { %v4962_v32 = vpop.f32.mrf.mxu0 }
 0x25e   : > { %v6010_v57 = vpop.f32.mrf.mxu0 }
 0x25f   : > { %6108 = vst [vmem:[#allocation7_spill] sm:$0xff] %v6010_v57  ;;  %v2307_v57 = vadd.f32 %v5980_v12, %v4798_v25 }
 0x260   : > { %v6014_v60 = vpop.f32.mrf.mxu0 }
 0x261   : > { %6110 = vst [vmem:[#allocation9_spill] sm:$0xff] %v6014_v60  ;;  %v2521_v60 = vadd.f32 %v4843_v27, %v2294_v49  ;;  %v2524_v28 = vadd.f32 %v4846_v33, %v2307_v57  ;;  %v2525_v27 = vadd.f32 %v4847_v7, %v2310_v22  ;;  %v6120_v22 = vld [vmem:[#allocation6_spill] sm:$0xff] }
 0x262   : > { %v6016_v24 = vpop.f32.mrf.mxu0 }
 0x263   : > { %6111 = vst [vmem:[#allocation10_spill] sm:$0xff] %v6016_v24  ;;  %v2519_v24 = vadd.f32 %v2490_v9, %v2286_v34  ;;  %v2691_v30 = vadd.f32 %v4867_v46, %v2521_v60  ;;  %v2694_v46 = vadd.f32 %v5992_v31, %v2524_v28  ;;  %v6114_v34 = vld [vmem:[#allocation8_spill] sm:$0xff] }
 0x264   : > { %v6018_v59 = vpop.f32.mrf.mxu0 }
 0x265   : > { %6112 = vst [vmem:[#allocation11_spill] sm:$0xff] %v6018_v59  ;;  %v2688_v59 = vadd.f32 %v2657_v0, %v2518_v52  ;;  %v2973_v51 = vadd.f32 %v4891_v18, %v2691_v30  ;;  %v2689_v61 = vadd.f32 %v2660_v3, %v2519_v24  ;;  %v2302_v0 = vadd.f32 %v5986_v21, %v5990_v5 }
 0x266   : > { %v4938_v29 = vpop.f32.mrf.mxu1  ;;  %v6020_v8 = vpop.f32.mrf.mxu0  ;;  %v2976_v3 = vadd.f32 %v4894_v36, %v2694_v46  ;;  %v2695_v21 = vadd.f32 %v5996_v45, %v2525_v27  ;;  %v6113_v6 = vld [vmem:[#allocation7_spill] sm:$0xff] }
 0x267   : > { %v2970_v55 = vadd.f32 %v2939_v35, %v2688_v59  ;;  %v2971_v10 = vadd.f32 %v2942_v43, %v2689_v61  ;;  %v3353_v11 = vadd.f32 %v4938_v29, %v3182_v17  ;;  %v2523_v13 = vadd.f32 %v2506_v63, %v2302_v0  ;;  %v6115_v36 = vld [vmem:[#allocation3_spill] sm:$0xff] }
 0x268   : > { %v3320_v56 = vpop.f32.mrf.mxu1  ;;  %v6022_v53 = vpop.f32.mrf.mxu0  ;;  %v3183_v33 = vadd.f32 %v4915_v41, %v2973_v51  ;;  %v2977_v63 = vadd.f32 %v4895_v1, %v2695_v21  ;;  %v3186_v38 = vadd.f32 %v6115_v36, %v2976_v3  ;;  %v6117_v29 = vld [vmem:[#allocation9_spill] sm:$0xff] }
 0x269   : > { %v3180_v9 = vadd.f32 %v3149_v50, %v2970_v55  ;;  %v3181_v35 = vadd.f32 %v6000_v15, %v2971_v10  ;;  %v3635_v50 = vadd.f32 %v4962_v32, %v3353_v11  ;;  %v2693_v31 = vadd.f32 %v5998_v4, %v2523_v13  ;;  %v6116_v32 = vld [vmem:[#allocation4_spill] sm:$0xff] }
 0x26a   : > { %v4939_v44 = vpop.f32.mrf.mxu1  ;;  %v6024_v39 = vpop.f32.mrf.mxu0  ;;  %v3184_v4 = vadd.f32 %v6116_v32, %v2974_v26  ;;  %v6119_v20 = vld [vmem:[#allocation10_spill] sm:$0xff] }
 0x26b   : > { %v3351_v48 = vadd.f32 %v3320_v56, %v3180_v9  ;;  %v3354_v7 = vadd.f32 %v4939_v44, %v3183_v33  ;;  %v2975_v15 = vadd.f32 %v6114_v34, %v2693_v31  ;;  %v6118_v44 = vld [vmem:[#allocation5_spill] sm:$0xff] }
 0x26c   : > { %v3323_v62 = vpop.f32.mrf.mxu1  ;;  %v4996_v40 = vpop.f32.mrf.mxu0  ;;  %v3187_v16 = vadd.f32 %v6118_v44, %v2977_v63 }
 0x26d   : > { %v3352_v41 = vadd.f32 %v3323_v62, %v3181_v35  ;;  %v3633_v43 = vadd.f32 %v6113_v6, %v3351_v48  ;;  %v3636_v24 = vadd.f32 %v6117_v29, %v3354_v7  ;;  %v4516_v62 = vld [vmem:[%s6094_s6] ss:$0 sm:$0xff]  ;;  %v3185_v28 = vadd.f32 %v6120_v22, %v2975_v15 }
 0x26e   : > { %v4942_v37 = vpop.f32.mrf.mxu1  ;;  %v3929_v25 = vpop.f32.mrf.mxu0 }
 0x26f   : > { %v3357_v56 = vadd.f32 %v4942_v37, %v3186_v38  ;;  %v3634_v55 = vadd.f32 %v6119_v20, %v3352_v41 }
 0x270   : > { %v3336_v47 = vpop.f32.mrf.mxu1  ;;  %v4997_v54 = vpop.f32.mrf.mxu0 }
 0x271   : > { %v3355_v59 = vadd.f32 %v3336_v47, %v3184_v4 }
 0x272   : > { %v4943_v12 = vpop.f32.mrf.mxu1  ;;  %v3932_v57 = vpop.f32.mrf.mxu0 }
 0x273   : > { %v3358_v30 = vadd.f32 %v4943_v12, %v3187_v16  ;;  %v3637_v12 = vadd.f32 %v6020_v8, %v3355_v59 }
 0x274   : > { %v3339_v5 = vpop.f32.mrf.mxu1  ;;  %v5000_v37 = vpop.f32.mrf.mxu0 }
 0x275   : > { %v3356_v0 = vadd.f32 %v3339_v5, %v3185_v28  ;;  %v3640_v33 = vadd.f32 %v6022_v53, %v3358_v30 }
 0x276   : > { %v3945_v19 = vpop.f32.mrf.mxu0 }
 0x277   : > { %v3638_v35 = vadd.f32 %v6024_v39, %v3356_v0 }
 0x278   : > { %v5001_v53 = vpop.f32.mrf.mxu0 }
 0x27a   : > { %v3948_v4 = vpop.f32.mrf.mxu0 }
 0x286   : > { %v4986_v18 = vpop.f32.mrf.mxu1 }
 0x287   : > { %v3845_v45 = vadd.f32 %v4986_v18, %v3635_v50 }
 0x288   : > { %v3812_v1 = vpop.f32.mrf.mxu1 }
 0x289   : > { %v3969_v58 = vadd.f32 %v6041_v42, %v3845_v45  ;;  %v3843_v60 = vadd.f32 %v3812_v1, %v3633_v43 }
 0x28a   : > { %v4987_v23 = vpop.f32.mrf.mxu1 }
 0x28b   : > { %v3977_v14 = vadd.f32 %v4996_v40, %v3969_v58  ;;  %v3967_v49 = vadd.f32 %v6041_v42, %v3843_v60  ;;  %v3846_v52 = vadd.f32 %v4987_v23, %v3636_v24  ;;  %v6121_v40 = vld [vmem:[#allocation11_spill] sm:$0xff] }
 0x28c   : > { %v3815_v2 = vpop.f32.mrf.mxu1  ;;  %v3639_v27 = vadd.f32 %v6121_v40, %v3357_v56 }
 0x28d   : > { %v3992_v47 = vadd.f32 %v4516_v62, %v3977_v14  ;;  %v3975_v51 = vadd.f32 %v3967_v49, %v3929_v25  ;;  %v3970_v61 = vadd.f32 %v6041_v42, %v3846_v52  ;;  %v3844_v17 = vadd.f32 %v3815_v2, %v3634_v55 }
 0x28e   : > { %v4990_v10 = vpop.f32.mrf.mxu1 }
 0x28f   : > { %v4000_v11 = vmax.f32 %v3992_v47, 0.0  ;;  %v3990_v9 = vadd.f32 %v4516_v62, %v3975_v51  ;;  %v3978_v13 = vadd.f32 %v4997_v54, %v3970_v61  ;;  %v3968_v25 = vadd.f32 %v6041_v42, %v3844_v17 }
 0x290   : > { %v3849_v46 = vadd.f32 %v4990_v10, %v3639_v27  ;;  %v3828_v48 = vpop.f32.mrf.mxu1 }
 0x291   : > { %4008 = vst [vmem:[%s6066_s25 + $0x10] sm:$0xff] %v4000_v11  ;;  %v3998_v3 = vmax.f32 %v3990_v9, 0.0  ;;  %v3993_v26 = vadd.f32 %v4516_v62, %v3978_v13  ;;  %v3976_v21 = vadd.f32 %v3968_v25, %v3932_v57  ;;  %v3847_v5 = vadd.f32 %v3828_v48, %v3637_v12 }
 0x292   : > { %v3973_v7 = vadd.f32 %v6041_v42, %v3849_v46  ;;  %v4991_v8 = vpop.f32.mrf.mxu1 }
 0x293   : > { %4006 = vst [vmem:[%s6066_s25] sm:$0xff] %v3998_v3  ;;  %v4001_v54 = vmax.f32 %v3993_v26, 0.0  ;;  %v3991_v50 = vadd.f32 %v4516_v62, %v3976_v21  ;;  %v3971_v63 = vadd.f32 %v6041_v42, %v3847_v5  ;;  %v3850_v31 = vadd.f32 %v4991_v8, %v3640_v33 }
 0x294   : > { %v3981_v18 = vadd.f32 %v5000_v37, %v3973_v7  ;;  %v3831_v41 = vpop.f32.mrf.mxu1 }
 0x295   : > { %4009 = vst [vmem:[%s6066_s25 + $0x18] sm:$0xff] %v4001_v54  ;;  %v3999_v45 = vmax.f32 %v3991_v50, 0.0  ;;  %v3979_v6 = vadd.f32 %v3971_v63, %v3945_v19  ;;  %v3974_v43 = vadd.f32 %v6041_v42, %v3850_v31  ;;  %v3848_v34 = vadd.f32 %v3831_v41, %v3638_v35 }
 0x296   : > { %v3996_v15 = vadd.f32 %v4516_v62, %v3981_v18 }
 0x297   : > { %4007 = vst [vmem:[%s6066_s25 + $0x8] sm:$0xff] %v3999_v45  ;;  %v3994_v39 = vadd.f32 %v4516_v62, %v3979_v6  ;;  %v3982_v36 = vadd.f32 %v5001_v53, %v3974_v43  ;;  %v3972_v38 = vadd.f32 %v6041_v42, %v3848_v34 }
 0x298   : > { %v4004_v32 = vmax.f32 %v3996_v15, 0.0 }
 0x299   : > { %v4002_v1 = vmax.f32 %v3994_v39, 0.0  ;;  %v3997_v57 = vadd.f32 %v4516_v62, %v3982_v36  ;;  %v3980_v58 = vadd.f32 %v3972_v38, %v3948_v4 }
 0x29a   : > { %4012 = vst [vmem:[%s6066_s25 + $0x30] sm:$0xff] %v4004_v32 }
 0x29b   : > { %4010 = vst [vmem:[%s6066_s25 + $0x20] sm:$0xff] %v4002_v1  ;;  %v4005_v60 = vmax.f32 %v3997_v57, 0.0  ;;  %v3995_v29 = vadd.f32 %v4516_v62, %v3980_v58 }
 0x29d   : > { %4013 = vst [vmem:[%s6066_s25 + $0x38] sm:$0xff] %v4005_v60  ;;  %v4003_v24 = vmax.f32 %v3995_v29, 0.0 }
 0x29f   : > { %4011 = vst [vmem:[%s6066_s25 + $0x28] sm:$0xff] %v4003_v24 }
 0x2a0 PF: > { %s17_s24 = sadd.s32 1, %s5140_s24  }
 0x2a1   : > { %p14_p5 = scmp.ge.s32.totalorder %s17_s24, 4  }
 0x2a3   :  { %16 = sbr.rel (!%p14_p5) target bundleno = 1 (0x1), region = 101 }

</bundles_post_ra>
